<compile_context>
chip_gen: v6e
topology: v6e:2x2x1
jax: 0.10.0
libtpu: 0.0.40
codegen_flags: <defaults>
</compile_context>

<pallas_src>
import math
import jax
import jax.numpy as jnp
from jax.experimental import pallas as pl
from jax.experimental.pallas import tpu as pltpu


# ----------------------------------------------------------------------------
# VMEM budget / tile helpers
# ----------------------------------------------------------------------------

_VMEM_LIMIT_CACHE = None


def _vmem_limit():
    """Per-generation scoped-VMEM budget: half of physical capacity
    (64 MiB on v5e/v6e, 32 MiB on v7x), with a safe fallback."""
    global _VMEM_LIMIT_CACHE
    if _VMEM_LIMIT_CACHE is None:
        try:
            cap = int(pltpu.get_tpu_info().vmem_capacity_bytes)
            _VMEM_LIMIT_CACHE = min(max(cap // 2, 16 * 1024 * 1024),
                                    64 * 1024 * 1024)
        except Exception:
            _VMEM_LIMIT_CACHE = 32 * 1024 * 1024
    return _VMEM_LIMIT_CACHE


def _choose_tile(dim, pref, align):
    """Largest tile <= pref dividing dim.  Prefers 256-aligned tiles (clean
    2x256^2 MXU cadence on v6e/v7x), then `align`-aligned; falls back to the
    full dimension (always a legal block size)."""
    if dim <= pref:
        return dim
    for step in (256, align):
        if step <= pref:
            t = (pref // step) * step
            while t >= step:
                if dim % t == 0:
                    return t
                t -= step
    return dim


def _split_for_cores(dim, t, align):
    """v7x has 2 TensorCores: ensure >= 2 steps along a parallel grid axis when
    it is free to do so (tile stays >= the bf16 (16,128) min tile)."""
    if dim // t < 2 and t % (2 * align) == 0 and t // 2 >= align:
        return t // 2
    return t


# ----------------------------------------------------------------------------
# Linear: X @ W (+ b) (+ fused activation) (+ fused residual-add + LayerNorm)
# ----------------------------------------------------------------------------

def _mm_epilogue(acc, b_ref, r_ref, g_ref, be_ref, act, eps):
    """f32 epilogue applied to the matmul accumulator."""
    if b_ref is not None:
        acc = acc + b_ref[...]
    if act == "relu":
        acc = jnp.maximum(acc, 0.0)
    elif act == "gelu":
        # TODO(synk): HF RoBERTa uses exact (erf) GELU; tanh approximation here.
        acc = jax.nn.gelu(acc, approximate=True)
    if g_ref is not None:
        x = acc
        if r_ref is not None:
            x = x + r_ref[...].astype(jnp.float32)
        mu = jnp.mean(x, axis=-1, keepdims=True)
        var = jnp.mean(jnp.square(x - mu), axis=-1, keepdims=True)
        x = (x - mu) * jax.lax.rsqrt(var + eps)
        acc = x * g_ref[...] + be_ref[...]
    return acc


def _linear_kernel_single(has_bias, has_ln, act, eps):
    def kernel(*refs):
        idx = 0
        x_ref = refs[idx]; idx += 1
        w_ref = refs[idx]; idx += 1
        b_ref = None
        if has_bias:
            b_ref = refs[idx]; idx += 1
        r_ref = g_ref = be_ref = None
        if has_ln:
            r_ref, g_ref, be_ref = refs[idx], refs[idx + 1], refs[idx + 2]
            idx += 3
        o_ref = refs[idx]
        acc = jnp.dot(x_ref[...], w_ref[...], preferred_element_type=jnp.float32)
        acc = _mm_epilogue(acc, b_ref, r_ref, g_ref, be_ref, act, eps)
        o_ref[...] = acc.astype(o_ref.dtype)
    return kernel


def _linear_kernel_ktiled(has_bias, has_ln, act, eps):
    def kernel(*refs):
        ins, o_ref, acc_ref = refs[:-2], refs[-2], refs[-1]
        idx = 0
        x_ref = ins[idx]; idx += 1
        w_ref = ins[idx]; idx += 1
        b_ref = None
        if has_bias:
            b_ref = ins[idx]; idx += 1
        r_ref = g_ref = be_ref = None
        if has_ln:
            r_ref, g_ref, be_ref = ins[idx], ins[idx + 1], ins[idx + 2]

        @pl.when(pl.program_id(2) == 0)
        def _():
            acc_ref[...] = jnp.zeros_like(acc_ref)

        acc_ref[...] += jnp.dot(x_ref[...], w_ref[...],
                                preferred_element_type=jnp.float32)

        @pl.when(pl.program_id(2) == pl.num_programs(2) - 1)
        def _():
            out = _mm_epilogue(acc_ref[...], b_ref, r_ref, g_ref, be_ref, act, eps)
            o_ref[...] = out.astype(o_ref.dtype)
    return kernel


def pallas_linear(x, w, b=None, act=None, residual=None, gamma=None, beta=None,
                  eps=1e-12, out_dtype=jnp.bfloat16):
    """x[M,K] @ w[K,N] (+b) (+act) (+ fused residual-add + LayerNorm) -> [M,N].

    bf16 MXU operands, f32 accumulation/epilogue, bf16 output (default).
    For K <= 1024 the contraction is a single pass (no K grid axis, no VMEM
    accumulator, no pl.when); larger K uses the K-tiled accumulator path."""
    M, K = x.shape
    K2, N = w.shape
    assert K == K2
    has_bias = b is not None
    has_ln = gamma is not None

    tm = _choose_tile(M, 256, 16)               # bf16 sublane align = 16
    tm = _split_for_cores(M, tm, 16)
    tn = N if has_ln else _choose_tile(N, 512, 128)
    single = K <= 1024
    tk = K if single else _choose_tile(K, 512, 256)

    args = [x, w]
    if single:
        grid = (M // tm, N // tn)
        in_specs = [pl.BlockSpec((tm, K), lambda i, j: (i, 0)),
                    pl.BlockSpec((K, tn), lambda i, j: (0, j))]
        if has_bias:
            in_specs.append(pl.BlockSpec((1, tn), lambda i, j: (0, j)))
            args.append(jnp.asarray(b, jnp.float32).reshape(1, N))
        if has_ln:
            in_specs += [pl.BlockSpec((tm, N), lambda i, j: (i, 0)),
                         pl.BlockSpec((1, N), lambda i, j: (0, 0)),
                         pl.BlockSpec((1, N), lambda i, j: (0, 0))]
            args += [residual,
                     jnp.asarray(gamma, jnp.float32).reshape(1, N),
                     jnp.asarray(beta, jnp.float32).reshape(1, N)]
        out_specs = pl.BlockSpec((tm, tn), lambda i, j: (i, j))
        kernel = _linear_kernel_single(has_bias, has_ln, act, eps)
        scratch = []
        sem = ("parallel", "parallel")
    else:
        grid = (M // tm, N // tn, K // tk)
        in_specs = [pl.BlockSpec((tm, tk), lambda i, j, k: (i, k)),
                    pl.BlockSpec((tk, tn), lambda i, j, k: (k, j))]
        if has_bias:
            in_specs.append(pl.BlockSpec((1, tn), lambda i, j, k: (0, j)))
            args.append(jnp.asarray(b, jnp.float32).reshape(1, N))
        if has_ln:
            in_specs += [pl.BlockSpec((tm, N), lambda i, j, k: (i, 0)),
                         pl.BlockSpec((1, N), lambda i, j, k: (0, 0)),
                         pl.BlockSpec((1, N), lambda i, j, k: (0, 0))]
            args += [residual,
                     jnp.asarray(gamma, jnp.float32).reshape(1, N),
                     jnp.asarray(beta, jnp.float32).reshape(1, N)]
        out_specs = pl.BlockSpec((tm, tn), lambda i, j, k: (i, j))
        kernel = _linear_kernel_ktiled(has_bias, has_ln, act, eps)
        scratch = [pltpu.VMEM((tm, tn), jnp.float32)]
        sem = ("parallel", "parallel", "arbitrary")

    return pl.pallas_call(
        kernel,
        grid=grid,
        in_specs=in_specs,
        out_specs=out_specs,
        out_shape=jax.ShapeDtypeStruct((M, N), out_dtype),
        scratch_shapes=scratch,
        compiler_params=pltpu.CompilerParams(
            dimension_semantics=sem,
            vmem_limit_bytes=_vmem_limit()),
    )(*args)


# ----------------------------------------------------------------------------
# Standalone LayerNorm (embeddings only; per-layer LNs are fused into matmuls)
# ----------------------------------------------------------------------------

def pallas_layernorm(x, gamma, beta, eps=1e-12, out_dtype=jnp.bfloat16):
    M, D = x.shape
    tm = _choose_tile(M, 512, 16)
    tm = _split_for_cores(M, tm, 16)

    def kernel(x_ref, g_ref, b_ref, o_ref):
        xv = x_ref[...].astype(jnp.float32)          # LN math stays in f32
        mu = jnp.mean(xv, axis=-1, keepdims=True)
        var = jnp.mean(jnp.square(xv - mu), axis=-1, keepdims=True)
        y = (xv - mu) * jax.lax.rsqrt(var + eps)
        y = y * g_ref[...] + b_ref[...]
        o_ref[...] = y.astype(o_ref.dtype)

    return pl.pallas_call(
        kernel,
        grid=(M // tm,),
        in_specs=[pl.BlockSpec((tm, D), lambda i: (i, 0)),
                  pl.BlockSpec((1, D), lambda i: (0, 0)),
                  pl.BlockSpec((1, D), lambda i: (0, 0))],
        out_specs=pl.BlockSpec((tm, D), lambda i: (i, 0)),
        out_shape=jax.ShapeDtypeStruct((M, D), out_dtype),
        compiler_params=pltpu.CompilerParams(
            dimension_semantics=("parallel",),
            vmem_limit_bytes=_vmem_limit()),
    )(x, jnp.asarray(gamma, jnp.float32).reshape(1, D),
      jnp.asarray(beta, jnp.float32).reshape(1, D))


# ----------------------------------------------------------------------------
# QKV projection: writes Q/K/V head-major [B, nH, S, Dh] directly via out_specs
# (softmax scale already folded into the Q weights/bias at init)
# ----------------------------------------------------------------------------

def pallas_qkv_proj(x, wq, wk, wv, bq, bk, bv):
    """x: [B, S, H] bf16; w*: [nH, H, Dh] bf16 head-major; b*: [nH, 1, Dh] f32.
    Returns (q, k, v), each [B, nH, S, Dh] bf16 — head-major so the MHA kernel
    never lane-slices at non-128-aligned offsets."""
    B, S, H = x.shape
    nH, _, Dh = wq.shape

    def kernel(x_ref, wq_ref, wk_ref, wv_ref, bq_ref, bk_ref, bv_ref,
               q_ref, k_ref, v_ref):
        xb = x_ref[0]                                             # [S, H] bf16
        q = jnp.dot(xb, wq_ref[0], preferred_element_type=jnp.float32) + bq_ref[0]
        k = jnp.dot(xb, wk_ref[0], preferred_element_type=jnp.float32) + bk_ref[0]
        v = jnp.dot(xb, wv_ref[0], preferred_element_type=jnp.float32) + bv_ref[0]
        q_ref[0, 0] = q.astype(q_ref.dtype)
        k_ref[0, 0] = k.astype(k_ref.dtype)
        v_ref[0, 0] = v.astype(v_ref.dtype)

    wspec = pl.BlockSpec((1, H, Dh), lambda b, h: (h, 0, 0))
    bspec = pl.BlockSpec((1, 1, Dh), lambda b, h: (h, 0, 0))
    ospec = pl.BlockSpec((1, 1, S, Dh), lambda b, h: (b, h, 0, 0))
    oshape = jax.ShapeDtypeStruct((B, nH, S, Dh), jnp.bfloat16)

    return pl.pallas_call(
        kernel,
        grid=(B, nH),
        in_specs=[pl.BlockSpec((1, S, H), lambda b, h: (b, 0, 0)),
                  wspec, wspec, wspec, bspec, bspec, bspec],
        out_specs=(ospec, ospec, ospec),
        out_shape=(oshape, oshape, oshape),
        compiler_params=pltpu.CompilerParams(
            dimension_semantics=("parallel", "arbitrary"),
            vmem_limit_bytes=_vmem_limit()),
    )(x, wq, wk, wv, bq, bk, bv)


# ----------------------------------------------------------------------------
# Multi-head attention: head-major inputs, query-row tiling, one lane-dense
# [tq, H] output store per block (heads concatenated in-register)
# ----------------------------------------------------------------------------

def pallas_mha(q, k, v, mask_bias):
    """q/k/v: [B, nH, S, Dh] bf16 head-major; mask_bias: [B, 1, S] f32 additive.
    Returns [B, S, H] bf16.  1/sqrt(Dh) is folded into the Q projection."""
    B, nH, S, Dh = q.shape
    H = nH * Dh
    tq = _choose_tile(S, 256, 16)               # bounds vreg pressure for long S

    def kernel(q_ref, k_ref, v_ref, m_ref, o_ref):
        bias = m_ref[0]                                           # [1, S] f32
        outs = []
        # TODO(synk): for very long S, switch to a flash-style KV loop; here the
        # full [S, Dh] K/V per head fits comfortably in VMEM/registers.
        for h in range(nH):                       # static loop, nH is small
            qh = q_ref[0, h]                                      # [tq, Dh] bf16
            kh = k_ref[0, h]                                      # [S, Dh]  bf16
            vh = v_ref[0, h]
            # contract last dims (no materialized transpose), f32 scores
            s = jax.lax.dot_general(qh, kh, (((1,), (1,)), ((), ())),
                                    preferred_element_type=jnp.float32)
            s = s + bias
            s = s - jnp.max(s, axis=-1, keepdims=True)
            p = jnp.exp(s)
            inv = pl.reciprocal(jnp.sum(p, axis=-1, keepdims=True), approx=True)
            p = (p * inv).astype(jnp.bfloat16)
            outs.append(jnp.dot(p, vh, preferred_element_type=jnp.float32))
        # one full-width lane-dense store instead of nH masked sub-128 stores
        o_ref[0] = jnp.concatenate(outs, axis=-1).astype(o_ref.dtype)

    return pl.pallas_call(
        kernel,
        grid=(B, S // tq),
        in_specs=[pl.BlockSpec((1, nH, tq, Dh), lambda b, i: (b, 0, i, 0)),
                  pl.BlockSpec((1, nH, S, Dh), lambda b, i: (b, 0, 0, 0)),
                  pl.BlockSpec((1, nH, S, Dh), lambda b, i: (b, 0, 0, 0)),
                  pl.BlockSpec((1, 1, S), lambda b, i: (b, 0, 0))],
        out_specs=pl.BlockSpec((1, tq, H), lambda b, i: (b, i, 0)),
        out_shape=jax.ShapeDtypeStruct((B, S, H), jnp.bfloat16),
        compiler_params=pltpu.CompilerParams(
            dimension_semantics=("parallel", "arbitrary"),
            vmem_limit_bytes=_vmem_limit()),
    )(q, k, v, mask_bias)


# ----------------------------------------------------------------------------
# Whole GCN in ONE kernel: 4x (GraphConv -> LayerNorm -> ReLU) + mean pool.
#   torch_geometric GraphConv: out = lin_rel(sum_j x_j) + lin_root(x)
# All feature dims are < 128 lanes, so the compute is microseconds; fusing the
# layers removes the per-launch / per-DMA overhead that dominated before.
# ----------------------------------------------------------------------------

def pallas_gcn_forward(adj, x, pool_mat, convs, lns, eps=1e-5):
    """adj: [N, N] dense (dst, src); x: [N, F0]; pool_mat: [G, N].
    Returns pooled graph embeddings [G, F_last] f32."""
    N, F0 = x.shape
    G = pool_mat.shape[0]
    F_last = convs[-1]["w_rel"].shape[1]
    n_layers = len(convs)

    def kernel(*refs):
        a_ref, x_ref, p_ref = refs[:3]
        lrefs = refs[3:3 + 5 * n_layers]
        o_ref = refs[3 + 5 * n_layers]
        a = a_ref[...]
        h = x_ref[...]
        for li in range(n_layers):
            wr, wo, b, g, bb = lrefs[5 * li: 5 * li + 5]
            agg = jnp.dot(a, h, preferred_element_type=jnp.float32)
            out = (jnp.dot(agg, wr[...], preferred_element_type=jnp.float32)
                   + jnp.dot(h, wo[...], preferred_element_type=jnp.float32)
                   + b[...])
            mu = jnp.mean(out, axis=-1, keepdims=True)
            var = jnp.mean(jnp.square(out - mu), axis=-1, keepdims=True)
            y = (out - mu) * jax.lax.rsqrt(var + eps)
            y = y * g[...] + bb[...]
            h = jnp.maximum(y, 0.0)
        # global mean pool fused into the same launch
        o_ref[...] = jnp.dot(p_ref[...], h, preferred_element_type=jnp.float32)

    def full(shape):
        nd = len(shape)
        return pl.BlockSpec(shape, lambda i, _nd=nd: (0,) * _nd)

    in_specs = [full((N, N)), full((N, F0)), full((G, N))]
    args = [adj, x, pool_mat]
    for cp, lp in zip(convs, lns):
        Fi, Fo = cp["w_rel"].shape
        in_specs += [full((Fi, Fo)), full((Fi, Fo)), full((1, Fo)),
                     full((1, Fo)), full((1, Fo))]
        args += [cp["w_rel"], cp["w_root"], cp["b"].reshape(1, Fo),
                 lp["g"].reshape(1, Fo), lp["b"].reshape(1, Fo)]

    return pl.pallas_call(
        kernel,
        grid=(1,),
        in_specs=in_specs,
        out_specs=full((G, F_last)),
        out_shape=jax.ShapeDtypeStruct((G, F_last), jnp.float32),
        compiler_params=pltpu.CompilerParams(
            dimension_semantics=("arbitrary",),
            vmem_limit_bytes=_vmem_limit()),
    )(*args)


# ----------------------------------------------------------------------------
# Model forward passes (glue orchestrating the Pallas kernels)
# ----------------------------------------------------------------------------

def roberta_forward(params, cfg, input_ids, attention_mask):
    """Mini RoBERTa encoder; returns last_hidden_state [B, S, H] (bf16)."""
    B, S = input_ids.shape
    H, pad_idx = cfg["hidden"], cfg["pad_idx"]

    mask_i = attention_mask.astype(jnp.int32)
    position_ids = jnp.cumsum(mask_i, axis=-1) * mask_i + pad_idx
    # Embedding gathers are glue; downstream math runs in Pallas.
    emb = (params["word_emb"][input_ids]
           + params["pos_emb"][position_ids]
           + params["type_emb"][0][None, None, :])
    h = pallas_layernorm(emb.reshape(B * S, H),
                         params["emb_ln_g"], params["emb_ln_b"], eps=1e-12)

    mask_bias = ((1.0 - attention_mask.astype(jnp.float32)) * -1e9).reshape(B, 1, S)

    for lp in params["layers"]:
        x3 = h.reshape(B, S, H)
        q, k, v = pallas_qkv_proj(x3, lp["wq"], lp["wk"], lp["wv"],
                                  lp["bq"], lp["bk"], lp["bv"])
        attn = pallas_mha(q, k, v, mask_bias)                    # [B, S, H] bf16
        # attention-output projection with residual-add + LayerNorm fused
        h = pallas_linear(attn.reshape(B * S, H), lp["ao_w"], lp["ao_b"],
                          residual=h, gamma=lp["ln1_g"], beta=lp["ln1_b"],
                          eps=1e-12)
        # FFN: GELU fused into the first projection, residual+LN into the second
        ff = pallas_linear(h, lp["fi_w"], lp["fi_b"], act="gelu")
        h = pallas_linear(ff, lp["fo_w"], lp["fo_b"],
                          residual=h, gamma=lp["ln2_g"], beta=lp["ln2_b"],
                          eps=1e-12)

    return h.reshape(B, S, H)


def new_pred_model_forward(params, cfg, input_ids, attention_mask,
                           node_x, adj, pool_mat):
    graph_vector = pallas_gcn_forward(adj, node_x, pool_mat,
                                      params["gcn"]["convs"],
                                      params["gcn"]["lns"], eps=1e-5)
    last_hidden = roberta_forward(params["roberta"], cfg, input_ids, attention_mask)
    token_embedding = last_hidden[:, 0, :].astype(jnp.float32)   # CLS token
    combined = jnp.concatenate([token_embedding, graph_vector], axis=1)
    # Final regressor is a [B, 320] x [320, 1] matmul — kept in plain JAX
    # (launch + DMA setup overhead > compute at this shape).
    return jnp.dot(combined, params["reg_w"]) + params["reg_b"]   # [B, 1]


# ----------------------------------------------------------------------------
# Deterministic parameter init (weights pre-cast to bf16, head-major QKV,
# softmax scale folded into Q)
# ----------------------------------------------------------------------------

def init_params(key, cfg):
    keys = iter(jax.random.split(key, 256))

    def nk():
        return next(keys)

    def lin(fi, fo, std=0.02):
        w = jax.random.normal(nk(), (fi, fo), jnp.float32) * std
        b = jnp.zeros((fo,), jnp.float32)
        return w, b

    H, nH, nL, inter, vocab, max_pos = (cfg["hidden"], cfg["heads"], cfg["layers"],
                                        cfg["intermediate"], cfg["vocab"],
                                        cfg["max_pos"])
    Dh = H // nH
    scale = 1.0 / math.sqrt(Dh)

    def head_major(w, b):
        # [H, H] -> [nH, H, Dh];  [H] -> [nH, 1, Dh]
        w3 = jnp.transpose(w.reshape(H, nH, Dh), (1, 0, 2))
        return w3, b.reshape(nH, 1, Dh)

    roberta = {
        "word_emb": jax.random.normal(nk(), (vocab, H), jnp.float32) * 0.02,
        "pos_emb": jax.random.normal(nk(), (max_pos, H), jnp.float32) * 0.02,
        "type_emb": jax.random.normal(nk(), (1, H), jnp.float32) * 0.02,
        "emb_ln_g": jnp.ones((H,), jnp.float32),
        "emb_ln_b": jnp.zeros((H,), jnp.float32),
        "layers": [],
    }
    for _ in range(nL):
        qw, qb = lin(H, H)
        kw, kb = lin(H, H)
        vw, vb = lin(H, H)
        aow, aob = lin(H, H)
        fiw, fib = lin(H, inter)
        fow, fob = lin(inter, H)
        # fold the 1/sqrt(Dh) softmax scale into the Q projection
        wq3, bq3 = head_major(qw * scale, qb * scale)
        wk3, bk3 = head_major(kw, kb)
        wv3, bv3 = head_major(vw, vb)
        roberta["layers"].append({
            # weights pre-cast to bf16 once (no per-call astype HBM round trips)
            "wq": wq3.astype(jnp.bfloat16), "bq": bq3,
            "wk": wk3.astype(jnp.bfloat16), "bk": bk3,
            "wv": wv3.astype(jnp.bfloat16), "bv": bv3,
            "ao_w": aow.astype(jnp.bfloat16), "ao_b": aob,
            "ln1_g": jnp.ones((H,), jnp.float32), "ln1_b": jnp.zeros((H,), jnp.float32),
            "fi_w": fiw.astype(jnp.bfloat16), "fi_b": fib,
            "fo_w": fow.astype(jnp.bfloat16), "fo_b": fob,
            "ln2_g": jnp.ones((H,), jnp.float32), "ln2_b": jnp.zeros((H,), jnp.float32),
        })

    # GCN weights stay f32: feature dims are tiny (< 128 lanes) and the whole
    # GCN runs in a single fused kernel, so there are no per-call casts anyway.
    gcn_dims = [cfg["node_feat"], 32, 64, 128, 256]
    gcn = {"convs": [], "lns": []}
    for fi, fo in zip(gcn_dims[:-1], gcn_dims[1:]):
        wr, br = lin(fi, fo, std=0.1)
        wroot, _ = lin(fi, fo, std=0.1)
        gcn["convs"].append({"w_rel": wr, "w_root": wroot, "b": br})
        gcn["lns"].append({"g": jnp.ones((fo,), jnp.float32),
                           "b": jnp.zeros((fo,), jnp.float32)})

    reg_w, reg_b = lin(H + 256, 1)
    return {"roberta": roberta, "gcn": gcn, "reg_w": reg_w, "reg_b": reg_b}


# ----------------------------------------------------------------------------
# Main
# ----------------------------------------------------------------------------

if __name__ == "__main__":
    cfg = {
        "hidden": 64,          # mini chemBERTa hidden size (real model: 768)
        "heads": 4,
        "intermediate": 128,
        "layers": 2,
        "vocab": 64,
        "max_pos": 12,
        "pad_idx": 1,
        "node_feat": 9,        # GCNEmbeddingModel feature_node_dim
    }

    B, S = 2, 8
    nodes_per_graph = 6
    N = B * nodes_per_graph

    key = jax.random.PRNGKey(0)
    k_param, k_ids, k_nodes = jax.random.split(key, 3)
    params = init_params(k_param, cfg)

    # --- token inputs ---
    input_ids = jax.random.randint(k_ids, (B, S), 2, cfg["vocab"], dtype=jnp.int32)
    attention_mask = jnp.array([[1] * S, [1] * 6 + [0] * 2], dtype=jnp.int32)

    # --- graph inputs (two chain graphs, undirected edges, PyG-style batch) ---
    node_x = jax.random.normal(k_nodes, (N, cfg["node_feat"]), jnp.float32)
    edges = []
    for g in range(B):
        off = g * nodes_per_graph
        for i in range(nodes_per_graph - 1):
            edges.append((off + i, off + i + 1))
            edges.append((off + i + 1, off + i))
    edge_index = jnp.array(edges, dtype=jnp.int32).T             # [2, E]
    # dense adjacency: adj[dst, src] = 1  (sum aggregation over neighbors)
    adj = jnp.zeros((N, N), jnp.float32).at[edge_index[1], edge_index[0]].add(1.0)
    batch = jnp.repeat(jnp.arange(B), nodes_per_graph)           # node -> graph id
    one_hot = jax.nn.one_hot(batch, B, dtype=jnp.float32)        # [N, B]
    counts = jnp.sum(one_hot, axis=0)                            # [B]
    pool_mat = one_hot.T / counts[:, None]                       # [B, N] mean-pool

    out = new_pred_model_forward(params, cfg, input_ids, attention_mask,
                                 node_x, adj, pool_mat)
    out = jax.block_until_ready(out)
    assert out.shape == (B, 1)
    assert bool(jnp.all(jnp.isfinite(out)))
    print("KERNEL_OK")
</pallas_src>

<mosaic_0001>
module attributes {stable_mosaic.version = 11 : i64} {
  func.func @kernel(%arg0: i32, %arg1: memref<12x12xf32, #tpu.memory_space<vmem>>, %arg2: memref<12x9xf32, #tpu.memory_space<vmem>>, %arg3: memref<2x12xf32, #tpu.memory_space<vmem>>, %arg4: memref<9x32xf32, #tpu.memory_space<vmem>>, %arg5: memref<9x32xf32, #tpu.memory_space<vmem>>, %arg6: memref<1x32xf32, #tpu.memory_space<vmem>>, %arg7: memref<1x32xf32, #tpu.memory_space<vmem>>, %arg8: memref<1x32xf32, #tpu.memory_space<vmem>>, %arg9: memref<32x64xf32, #tpu.memory_space<vmem>>, %arg10: memref<32x64xf32, #tpu.memory_space<vmem>>, %arg11: memref<1x64xf32, #tpu.memory_space<vmem>>, %arg12: memref<1x64xf32, #tpu.memory_space<vmem>>, %arg13: memref<1x64xf32, #tpu.memory_space<vmem>>, %arg14: memref<64x128xf32, #tpu.memory_space<vmem>>, %arg15: memref<64x128xf32, #tpu.memory_space<vmem>>, %arg16: memref<1x128xf32, #tpu.memory_space<vmem>>, %arg17: memref<1x128xf32, #tpu.memory_space<vmem>>, %arg18: memref<1x128xf32, #tpu.memory_space<vmem>>, %arg19: memref<128x256xf32, #tpu.memory_space<vmem>>, %arg20: memref<128x256xf32, #tpu.memory_space<vmem>>, %arg21: memref<1x256xf32, #tpu.memory_space<vmem>>, %arg22: memref<1x256xf32, #tpu.memory_space<vmem>>, %arg23: memref<1x256xf32, #tpu.memory_space<vmem>>, %arg24: memref<2x256xf32, #tpu.memory_space<vmem>>) attributes {dimension_semantics = [#tpu.dimension_semantics<arbitrary>], iteration_bounds = array<i64: 1>, scalar_prefetch = 0 : i64, scratch_operands = 0 : i64, tpu.core_type = #tpu.core_type<tc>, window_params = [{pipeline_mode = #tpu.pipeline_mode<synchronous>, transform_indices = @transform_0, window_bounds = array<i64: 12, 12>}, {pipeline_mode = #tpu.pipeline_mode<synchronous>, transform_indices = @transform_1, window_bounds = array<i64: 12, 9>}, {pipeline_mode = #tpu.pipeline_mode<synchronous>, transform_indices = @transform_2, window_bounds = array<i64: 2, 12>}, {pipeline_mode = #tpu.pipeline_mode<synchronous>, transform_indices = @transform_3, window_bounds = array<i64: 9, 32>}, {pipeline_mode = #tpu.pipeline_mode<synchronous>, transform_indices = @transform_4, window_bounds = array<i64: 9, 32>}, {pipeline_mode = #tpu.pipeline_mode<synchronous>, transform_indices = @transform_5, window_bounds = array<i64: 1, 32>}, {pipeline_mode = #tpu.pipeline_mode<synchronous>, transform_indices = @transform_6, window_bounds = array<i64: 1, 32>}, {pipeline_mode = #tpu.pipeline_mode<synchronous>, transform_indices = @transform_7, window_bounds = array<i64: 1, 32>}, {pipeline_mode = #tpu.pipeline_mode<synchronous>, transform_indices = @transform_8, window_bounds = array<i64: 32, 64>}, {pipeline_mode = #tpu.pipeline_mode<synchronous>, transform_indices = @transform_9, window_bounds = array<i64: 32, 64>}, {pipeline_mode = #tpu.pipeline_mode<synchronous>, transform_indices = @transform_10, window_bounds = array<i64: 1, 64>}, {pipeline_mode = #tpu.pipeline_mode<synchronous>, transform_indices = @transform_11, window_bounds = array<i64: 1, 64>}, {pipeline_mode = #tpu.pipeline_mode<synchronous>, transform_indices = @transform_12, window_bounds = array<i64: 1, 64>}, {pipeline_mode = #tpu.pipeline_mode<synchronous>, transform_indices = @transform_13, window_bounds = array<i64: 64, 128>}, {pipeline_mode = #tpu.pipeline_mode<synchronous>, transform_indices = @transform_14, window_bounds = array<i64: 64, 128>}, {pipeline_mode = #tpu.pipeline_mode<synchronous>, transform_indices = @transform_15, window_bounds = array<i64: 1, 128>}, {pipeline_mode = #tpu.pipeline_mode<synchronous>, transform_indices = @transform_16, window_bounds = array<i64: 1, 128>}, {pipeline_mode = #tpu.pipeline_mode<synchronous>, transform_indices = @transform_17, window_bounds = array<i64: 1, 128>}, {pipeline_mode = #tpu.pipeline_mode<synchronous>, transform_indices = @transform_18, window_bounds = array<i64: 128, 256>}, {pipeline_mode = #tpu.pipeline_mode<synchronous>, transform_indices = @transform_19, window_bounds = array<i64: 128, 256>}, {pipeline_mode = #tpu.pipeline_mode<synchronous>, transform_indices = @transform_20, window_bounds = array<i64: 1, 256>}, {pipeline_mode = #tpu.pipeline_mode<synchronous>, transform_indices = @transform_21, window_bounds = array<i64: 1, 256>}, {pipeline_mode = #tpu.pipeline_mode<synchronous>, transform_indices = @transform_22, window_bounds = array<i64: 1, 256>}, {pipeline_mode = #tpu.pipeline_mode<synchronous>, transform_indices = @transform_23, window_bounds = array<i64: 2, 256>}]} {
    %c0 = arith.constant 0 : index
    %c0_0 = arith.constant 0 : index
    %0 = vector.load %arg1[%c0, %c0_0] : memref<12x12xf32, #tpu.memory_space<vmem>>, vector<12x12xf32>
    %c0_1 = arith.constant 0 : index
    %c0_2 = arith.constant 0 : index
    %1 = vector.load %arg2[%c0_1, %c0_2] : memref<12x9xf32, #tpu.memory_space<vmem>>, vector<12x9xf32>
    %cst = arith.constant dense<0.000000e+00> : vector<12x9xf32>
    %2 = tpu.matmul %0, %1, %cst {dimension_numbers = #tpu.dot_dimension_numbers<[1], [0], [0], [1], [0, 0, 1, 1], [], []>} : vector<12x12xf32>, vector<12x9xf32>, vector<12x9xf32> -> vector<12x9xf32>
    %c0_3 = arith.constant 0 : index
    %c0_4 = arith.constant 0 : index
    %3 = vector.load %arg4[%c0_3, %c0_4] : memref<9x32xf32, #tpu.memory_space<vmem>>, vector<9x32xf32>
    %cst_5 = arith.constant dense<0.000000e+00> : vector<12x32xf32>
    %4 = tpu.matmul %2, %3, %cst_5 {dimension_numbers = #tpu.dot_dimension_numbers<[1], [0], [0], [1], [0, 0, 1, 1], [], []>} : vector<12x9xf32>, vector<9x32xf32>, vector<12x32xf32> -> vector<12x32xf32>
    %c0_6 = arith.constant 0 : index
    %c0_7 = arith.constant 0 : index
    %5 = vector.load %arg5[%c0_6, %c0_7] : memref<9x32xf32, #tpu.memory_space<vmem>>, vector<9x32xf32>
    %cst_8 = arith.constant dense<0.000000e+00> : vector<12x32xf32>
    %6 = tpu.matmul %1, %5, %cst_8 {dimension_numbers = #tpu.dot_dimension_numbers<[1], [0], [0], [1], [0, 0, 1, 1], [], []>} : vector<12x9xf32>, vector<9x32xf32>, vector<12x32xf32> -> vector<12x32xf32>
    %7 = arith.addf %4, %6 : vector<12x32xf32>
    %c0_9 = arith.constant 0 : index
    %c0_10 = arith.constant 0 : index
    %8 = vector.load %arg6[%c0_9, %c0_10] : memref<1x32xf32, #tpu.memory_space<vmem>>, vector<1x32xf32>
    %9 = vector.broadcast %8 : vector<1x32xf32> to vector<12x32xf32>
    %10 = arith.addf %7, %9 : vector<12x32xf32>
    %cst_11 = arith.constant dense<0.000000e+00> : vector<12xf32>
    %11 = vector.multi_reduction <add>, %10, %cst_11 [1] : vector<12x32xf32> to vector<12xf32>
    %12 = vector.shape_cast %11 : vector<12xf32> to vector<12x1xf32>
    %cst_12 = arith.constant 3.200000e+01 : f32
    %13 = vector.broadcast %cst_12 : f32 to vector<12x1xf32>
    %14 = arith.divf %12, %13 : vector<12x1xf32>
    %15 = vector.broadcast %14 : vector<12x1xf32> to vector<12x32xf32>
    %16 = arith.subf %10, %15 : vector<12x32xf32>
    %17 = arith.mulf %16, %16 : vector<12x32xf32>
    %cst_13 = arith.constant dense<0.000000e+00> : vector<12xf32>
    %18 = vector.multi_reduction <add>, %17, %cst_13 [1] : vector<12x32xf32> to vector<12xf32>
    %19 = vector.shape_cast %18 : vector<12xf32> to vector<12x1xf32>
    %cst_14 = arith.constant 3.200000e+01 : f32
    %20 = vector.broadcast %cst_14 : f32 to vector<12x1xf32>
    %21 = arith.divf %19, %20 : vector<12x1xf32>
    %22 = vector.broadcast %14 : vector<12x1xf32> to vector<12x32xf32>
    %23 = arith.subf %10, %22 : vector<12x32xf32>
    %cst_15 = arith.constant 9.99999974E-6 : f32
    %24 = vector.broadcast %cst_15 : f32 to vector<12x1xf32>
    %25 = arith.addf %21, %24 : vector<12x1xf32>
    %26 = math.rsqrt %25 : vector<12x1xf32>
    %27 = vector.broadcast %26 : vector<12x1xf32> to vector<12x32xf32>
    %28 = arith.mulf %23, %27 : vector<12x32xf32>
    %c0_16 = arith.constant 0 : index
    %c0_17 = arith.constant 0 : index
    %29 = vector.load %arg7[%c0_16, %c0_17] : memref<1x32xf32, #tpu.memory_space<vmem>>, vector<1x32xf32>
    %30 = vector.broadcast %29 : vector<1x32xf32> to vector<12x32xf32>
    %31 = arith.mulf %28, %30 : vector<12x32xf32>
    %c0_18 = arith.constant 0 : index
    %c0_19 = arith.constant 0 : index
    %32 = vector.load %arg8[%c0_18, %c0_19] : memref<1x32xf32, #tpu.memory_space<vmem>>, vector<1x32xf32>
    %33 = vector.broadcast %32 : vector<1x32xf32> to vector<12x32xf32>
    %34 = arith.addf %31, %33 : vector<12x32xf32>
    %cst_20 = arith.constant 0.000000e+00 : f32
    %35 = vector.broadcast %cst_20 : f32 to vector<12x32xf32>
    %36 = arith.maximumf %34, %35 : vector<12x32xf32>
    %cst_21 = arith.constant dense<0.000000e+00> : vector<12x32xf32>
    %37 = tpu.matmul %0, %36, %cst_21 {dimension_numbers = #tpu.dot_dimension_numbers<[1], [0], [0], [1], [0, 0, 1, 1], [], []>} : vector<12x12xf32>, vector<12x32xf32>, vector<12x32xf32> -> vector<12x32xf32>
    %c0_22 = arith.constant 0 : index
    %c0_23 = arith.constant 0 : index
    %38 = vector.load %arg9[%c0_22, %c0_23] : memref<32x64xf32, #tpu.memory_space<vmem>>, vector<32x64xf32>
    %cst_24 = arith.constant dense<0.000000e+00> : vector<12x64xf32>
    %39 = tpu.matmul %37, %38, %cst_24 {dimension_numbers = #tpu.dot_dimension_numbers<[1], [0], [0], [1], [0, 0, 1, 1], [], []>} : vector<12x32xf32>, vector<32x64xf32>, vector<12x64xf32> -> vector<12x64xf32>
    %c0_25 = arith.constant 0 : index
    %c0_26 = arith.constant 0 : index
    %40 = vector.load %arg10[%c0_25, %c0_26] : memref<32x64xf32, #tpu.memory_space<vmem>>, vector<32x64xf32>
    %cst_27 = arith.constant dense<0.000000e+00> : vector<12x64xf32>
    %41 = tpu.matmul %36, %40, %cst_27 {dimension_numbers = #tpu.dot_dimension_numbers<[1], [0], [0], [1], [0, 0, 1, 1], [], []>} : vector<12x32xf32>, vector<32x64xf32>, vector<12x64xf32> -> vector<12x64xf32>
    %42 = arith.addf %39, %41 : vector<12x64xf32>
    %c0_28 = arith.constant 0 : index
    %c0_29 = arith.constant 0 : index
    %43 = vector.load %arg11[%c0_28, %c0_29] : memref<1x64xf32, #tpu.memory_space<vmem>>, vector<1x64xf32>
    %44 = vector.broadcast %43 : vector<1x64xf32> to vector<12x64xf32>
    %45 = arith.addf %42, %44 : vector<12x64xf32>
    %cst_30 = arith.constant dense<0.000000e+00> : vector<12xf32>
    %46 = vector.multi_reduction <add>, %45, %cst_30 [1] : vector<12x64xf32> to vector<12xf32>
    %47 = vector.shape_cast %46 : vector<12xf32> to vector<12x1xf32>
    %cst_31 = arith.constant 6.400000e+01 : f32
    %48 = vector.broadcast %cst_31 : f32 to vector<12x1xf32>
    %49 = arith.divf %47, %48 : vector<12x1xf32>
    %50 = vector.broadcast %49 : vector<12x1xf32> to vector<12x64xf32>
    %51 = arith.subf %45, %50 : vector<12x64xf32>
    %52 = arith.mulf %51, %51 : vector<12x64xf32>
    %cst_32 = arith.constant dense<0.000000e+00> : vector<12xf32>
    %53 = vector.multi_reduction <add>, %52, %cst_32 [1] : vector<12x64xf32> to vector<12xf32>
    %54 = vector.shape_cast %53 : vector<12xf32> to vector<12x1xf32>
    %cst_33 = arith.constant 6.400000e+01 : f32
    %55 = vector.broadcast %cst_33 : f32 to vector<12x1xf32>
    %56 = arith.divf %54, %55 : vector<12x1xf32>
    %57 = vector.broadcast %49 : vector<12x1xf32> to vector<12x64xf32>
    %58 = arith.subf %45, %57 : vector<12x64xf32>
    %cst_34 = arith.constant 9.99999974E-6 : f32
    %59 = vector.broadcast %cst_34 : f32 to vector<12x1xf32>
    %60 = arith.addf %56, %59 : vector<12x1xf32>
    %61 = math.rsqrt %60 : vector<12x1xf32>
    %62 = vector.broadcast %61 : vector<12x1xf32> to vector<12x64xf32>
    %63 = arith.mulf %58, %62 : vector<12x64xf32>
    %c0_35 = arith.constant 0 : index
    %c0_36 = arith.constant 0 : index
    %64 = vector.load %arg12[%c0_35, %c0_36] : memref<1x64xf32, #tpu.memory_space<vmem>>, vector<1x64xf32>
    %65 = vector.broadcast %64 : vector<1x64xf32> to vector<12x64xf32>
    %66 = arith.mulf %63, %65 : vector<12x64xf32>
    %c0_37 = arith.constant 0 : index
    %c0_38 = arith.constant 0 : index
    %67 = vector.load %arg13[%c0_37, %c0_38] : memref<1x64xf32, #tpu.memory_space<vmem>>, vector<1x64xf32>
    %68 = vector.broadcast %67 : vector<1x64xf32> to vector<12x64xf32>
    %69 = arith.addf %66, %68 : vector<12x64xf32>
    %cst_39 = arith.constant 0.000000e+00 : f32
    %70 = vector.broadcast %cst_39 : f32 to vector<12x64xf32>
    %71 = arith.maximumf %69, %70 : vector<12x64xf32>
    %cst_40 = arith.constant dense<0.000000e+00> : vector<12x64xf32>
    %72 = tpu.matmul %0, %71, %cst_40 {dimension_numbers = #tpu.dot_dimension_numbers<[1], [0], [0], [1], [0, 0, 1, 1], [], []>} : vector<12x12xf32>, vector<12x64xf32>, vector<12x64xf32> -> vector<12x64xf32>
    %c0_41 = arith.constant 0 : index
    %c0_42 = arith.constant 0 : index
    %73 = vector.load %arg14[%c0_41, %c0_42] : memref<64x128xf32, #tpu.memory_space<vmem>>, vector<64x128xf32>
    %cst_43 = arith.constant dense<0.000000e+00> : vector<12x128xf32>
    %74 = tpu.matmul %72, %73, %cst_43 {dimension_numbers = #tpu.dot_dimension_numbers<[1], [0], [0], [1], [0, 0, 1, 1], [], []>} : vector<12x64xf32>, vector<64x128xf32>, vector<12x128xf32> -> vector<12x128xf32>
    %c0_44 = arith.constant 0 : index
    %c0_45 = arith.constant 0 : index
    %75 = vector.load %arg15[%c0_44, %c0_45] : memref<64x128xf32, #tpu.memory_space<vmem>>, vector<64x128xf32>
    %cst_46 = arith.constant dense<0.000000e+00> : vector<12x128xf32>
    %76 = tpu.matmul %71, %75, %cst_46 {dimension_numbers = #tpu.dot_dimension_numbers<[1], [0], [0], [1], [0, 0, 1, 1], [], []>} : vector<12x64xf32>, vector<64x128xf32>, vector<12x128xf32> -> vector<12x128xf32>
    %77 = arith.addf %74, %76 : vector<12x128xf32>
    %c0_47 = arith.constant 0 : index
    %c0_48 = arith.constant 0 : index
    %78 = vector.load %arg16[%c0_47, %c0_48] : memref<1x128xf32, #tpu.memory_space<vmem>>, vector<1x128xf32>
    %79 = vector.broadcast %78 : vector<1x128xf32> to vector<12x128xf32>
    %80 = arith.addf %77, %79 : vector<12x128xf32>
    %cst_49 = arith.constant dense<0.000000e+00> : vector<12xf32>
    %81 = vector.multi_reduction <add>, %80, %cst_49 [1] : vector<12x128xf32> to vector<12xf32>
    %82 = vector.shape_cast %81 : vector<12xf32> to vector<12x1xf32>
    %cst_50 = arith.constant 1.280000e+02 : f32
    %83 = vector.broadcast %cst_50 : f32 to vector<12x1xf32>
    %84 = arith.divf %82, %83 : vector<12x1xf32>
    %85 = vector.broadcast %84 : vector<12x1xf32> to vector<12x128xf32>
    %86 = arith.subf %80, %85 : vector<12x128xf32>
    %87 = arith.mulf %86, %86 : vector<12x128xf32>
    %cst_51 = arith.constant dense<0.000000e+00> : vector<12xf32>
    %88 = vector.multi_reduction <add>, %87, %cst_51 [1] : vector<12x128xf32> to vector<12xf32>
    %89 = vector.shape_cast %88 : vector<12xf32> to vector<12x1xf32>
    %cst_52 = arith.constant 1.280000e+02 : f32
    %90 = vector.broadcast %cst_52 : f32 to vector<12x1xf32>
    %91 = arith.divf %89, %90 : vector<12x1xf32>
    %92 = vector.broadcast %84 : vector<12x1xf32> to vector<12x128xf32>
    %93 = arith.subf %80, %92 : vector<12x128xf32>
    %cst_53 = arith.constant 9.99999974E-6 : f32
    %94 = vector.broadcast %cst_53 : f32 to vector<12x1xf32>
    %95 = arith.addf %91, %94 : vector<12x1xf32>
    %96 = math.rsqrt %95 : vector<12x1xf32>
    %97 = vector.broadcast %96 : vector<12x1xf32> to vector<12x128xf32>
    %98 = arith.mulf %93, %97 : vector<12x128xf32>
    %c0_54 = arith.constant 0 : index
    %c0_55 = arith.constant 0 : index
    %99 = vector.load %arg17[%c0_54, %c0_55] : memref<1x128xf32, #tpu.memory_space<vmem>>, vector<1x128xf32>
    %100 = vector.broadcast %99 : vector<1x128xf32> to vector<12x128xf32>
    %101 = arith.mulf %98, %100 : vector<12x128xf32>
    %c0_56 = arith.constant 0 : index
    %c0_57 = arith.constant 0 : index
    %102 = vector.load %arg18[%c0_56, %c0_57] : memref<1x128xf32, #tpu.memory_space<vmem>>, vector<1x128xf32>
    %103 = vector.broadcast %102 : vector<1x128xf32> to vector<12x128xf32>
    %104 = arith.addf %101, %103 : vector<12x128xf32>
    %cst_58 = arith.constant 0.000000e+00 : f32
    %105 = vector.broadcast %cst_58 : f32 to vector<12x128xf32>
    %106 = arith.maximumf %104, %105 : vector<12x128xf32>
    %cst_59 = arith.constant dense<0.000000e+00> : vector<12x128xf32>
    %107 = tpu.matmul %0, %106, %cst_59 {dimension_numbers = #tpu.dot_dimension_numbers<[1], [0], [0], [1], [0, 0, 1, 1], [], []>} : vector<12x12xf32>, vector<12x128xf32>, vector<12x128xf32> -> vector<12x128xf32>
    %c0_60 = arith.constant 0 : index
    %c0_61 = arith.constant 0 : index
    %108 = vector.load %arg19[%c0_60, %c0_61] : memref<128x256xf32, #tpu.memory_space<vmem>>, vector<128x256xf32>
    %cst_62 = arith.constant dense<0.000000e+00> : vector<12x256xf32>
    %109 = tpu.matmul %107, %108, %cst_62 {dimension_numbers = #tpu.dot_dimension_numbers<[1], [0], [0], [1], [0, 0, 1, 1], [], []>} : vector<12x128xf32>, vector<128x256xf32>, vector<12x256xf32> -> vector<12x256xf32>
    %c0_63 = arith.constant 0 : index
    %c0_64 = arith.constant 0 : index
    %110 = vector.load %arg20[%c0_63, %c0_64] : memref<128x256xf32, #tpu.memory_space<vmem>>, vector<128x256xf32>
    %cst_65 = arith.constant dense<0.000000e+00> : vector<12x256xf32>
    %111 = tpu.matmul %106, %110, %cst_65 {dimension_numbers = #tpu.dot_dimension_numbers<[1], [0], [0], [1], [0, 0, 1, 1], [], []>} : vector<12x128xf32>, vector<128x256xf32>, vector<12x256xf32> -> vector<12x256xf32>
    %112 = arith.addf %109, %111 : vector<12x256xf32>
    %c0_66 = arith.constant 0 : index
    %c0_67 = arith.constant 0 : index
    %113 = vector.load %arg21[%c0_66, %c0_67] : memref<1x256xf32, #tpu.memory_space<vmem>>, vector<1x256xf32>
    %114 = vector.broadcast %113 : vector<1x256xf32> to vector<12x256xf32>
    %115 = arith.addf %112, %114 : vector<12x256xf32>
    %cst_68 = arith.constant dense<0.000000e+00> : vector<12xf32>
    %116 = vector.multi_reduction <add>, %115, %cst_68 [1] : vector<12x256xf32> to vector<12xf32>
    %117 = vector.shape_cast %116 : vector<12xf32> to vector<12x1xf32>
    %cst_69 = arith.constant 2.560000e+02 : f32
    %118 = vector.broadcast %cst_69 : f32 to vector<12x1xf32>
    %119 = arith.divf %117, %118 : vector<12x1xf32>
    %120 = vector.broadcast %119 : vector<12x1xf32> to vector<12x256xf32>
    %121 = arith.subf %115, %120 : vector<12x256xf32>
    %122 = arith.mulf %121, %121 : vector<12x256xf32>
    %cst_70 = arith.constant dense<0.000000e+00> : vector<12xf32>
    %123 = vector.multi_reduction <add>, %122, %cst_70 [1] : vector<12x256xf32> to vector<12xf32>
    %124 = vector.shape_cast %123 : vector<12xf32> to vector<12x1xf32>
    %cst_71 = arith.constant 2.560000e+02 : f32
    %125 = vector.broadcast %cst_71 : f32 to vector<12x1xf32>
    %126 = arith.divf %124, %125 : vector<12x1xf32>
    %127 = vector.broadcast %119 : vector<12x1xf32> to vector<12x256xf32>
    %128 = arith.subf %115, %127 : vector<12x256xf32>
    %cst_72 = arith.constant 9.99999974E-6 : f32
    %129 = vector.broadcast %cst_72 : f32 to vector<12x1xf32>
    %130 = arith.addf %126, %129 : vector<12x1xf32>
    %131 = math.rsqrt %130 : vector<12x1xf32>
    %132 = vector.broadcast %131 : vector<12x1xf32> to vector<12x256xf32>
    %133 = arith.mulf %128, %132 : vector<12x256xf32>
    %c0_73 = arith.constant 0 : index
    %c0_74 = arith.constant 0 : index
    %134 = vector.load %arg22[%c0_73, %c0_74] : memref<1x256xf32, #tpu.memory_space<vmem>>, vector<1x256xf32>
    %135 = vector.broadcast %134 : vector<1x256xf32> to vector<12x256xf32>
    %136 = arith.mulf %133, %135 : vector<12x256xf32>
    %c0_75 = arith.constant 0 : index
    %c0_76 = arith.constant 0 : index
    %137 = vector.load %arg23[%c0_75, %c0_76] : memref<1x256xf32, #tpu.memory_space<vmem>>, vector<1x256xf32>
    %138 = vector.broadcast %137 : vector<1x256xf32> to vector<12x256xf32>
    %139 = arith.addf %136, %138 : vector<12x256xf32>
    %cst_77 = arith.constant 0.000000e+00 : f32
    %140 = vector.broadcast %cst_77 : f32 to vector<12x256xf32>
    %141 = arith.maximumf %139, %140 : vector<12x256xf32>
    %c0_78 = arith.constant 0 : index
    %c0_79 = arith.constant 0 : index
    %142 = vector.load %arg3[%c0_78, %c0_79] : memref<2x12xf32, #tpu.memory_space<vmem>>, vector<2x12xf32>
    %cst_80 = arith.constant dense<0.000000e+00> : vector<2x256xf32>
    %143 = tpu.matmul %142, %141, %cst_80 {dimension_numbers = #tpu.dot_dimension_numbers<[1], [0], [0], [1], [0, 0, 1, 1], [], []>} : vector<2x12xf32>, vector<12x256xf32>, vector<2x256xf32> -> vector<2x256xf32>
    %c0_81 = arith.constant 0 : index
    %c0_82 = arith.constant 0 : index
    %144 = vector.load %arg24[%c0_81, %c0_82] : memref<2x256xf32, #tpu.memory_space<vmem>>, vector<2x256xf32>
    tpu.vector_store %arg24[%c0_81, %c0_82], %143 {strides = array<i32>} : memref<2x256xf32, #tpu.memory_space<vmem>>, vector<2x256xf32>,
    return
  }
  func.func @transform_0(%arg0: i32) -> (i32, i32) {
    %c0_i32 = arith.constant 0 : i32
    %c0_i32_0 = arith.constant 0 : i32
    %c0_i32_1 = arith.constant 0 : i32
    return %c0_i32, %c0_i32_0 : i32, i32
  }
  func.func @transform_1(%arg0: i32) -> (i32, i32) {
    %c0_i32 = arith.constant 0 : i32
    %c0_i32_0 = arith.constant 0 : i32
    %c0_i32_1 = arith.constant 0 : i32
    return %c0_i32, %c0_i32_0 : i32, i32
  }
  func.func @transform_2(%arg0: i32) -> (i32, i32) {
    %c0_i32 = arith.constant 0 : i32
    %c0_i32_0 = arith.constant 0 : i32
    %c0_i32_1 = arith.constant 0 : i32
    return %c0_i32, %c0_i32_0 : i32, i32
  }
  func.func @transform_3(%arg0: i32) -> (i32, i32) {
    %c0_i32 = arith.constant 0 : i32
    %c0_i32_0 = arith.constant 0 : i32
    %c0_i32_1 = arith.constant 0 : i32
    return %c0_i32, %c0_i32_0 : i32, i32
  }
  func.func @transform_4(%arg0: i32) -> (i32, i32) {
    %c0_i32 = arith.constant 0 : i32
    %c0_i32_0 = arith.constant 0 : i32
    %c0_i32_1 = arith.constant 0 : i32
    return %c0_i32, %c0_i32_0 : i32, i32
  }
  func.func @transform_5(%arg0: i32) -> (i32, i32) {
    %c0_i32 = arith.constant 0 : i32
    %c0_i32_0 = arith.constant 0 : i32
    %c0_i32_1 = arith.constant 0 : i32
    return %c0_i32, %c0_i32_0 : i32, i32
  }
  func.func @transform_6(%arg0: i32) -> (i32, i32) {
    %c0_i32 = arith.constant 0 : i32
    %c0_i32_0 = arith.constant 0 : i32
    %c0_i32_1 = arith.constant 0 : i32
    return %c0_i32, %c0_i32_0 : i32, i32
  }
  func.func @transform_7(%arg0: i32) -> (i32, i32) {
    %c0_i32 = arith.constant 0 : i32
    %c0_i32_0 = arith.constant 0 : i32
    %c0_i32_1 = arith.constant 0 : i32
    return %c0_i32, %c0_i32_0 : i32, i32
  }
  func.func @transform_8(%arg0: i32) -> (i32, i32) {
    %c0_i32 = arith.constant 0 : i32
    %c0_i32_0 = arith.constant 0 : i32
    %c0_i32_1 = arith.constant 0 : i32
    return %c0_i32, %c0_i32_0 : i32, i32
  }
  func.func @transform_9(%arg0: i32) -> (i32, i32) {
    %c0_i32 = arith.constant 0 : i32
    %c0_i32_0 = arith.constant 0 : i32
    %c0_i32_1 = arith.constant 0 : i32
    return %c0_i32, %c0_i32_0 : i32, i32
  }
  func.func @transform_10(%arg0: i32) -> (i32, i32) {
    %c0_i32 = arith.constant 0 : i32
    %c0_i32_0 = arith.constant 0 : i32
    %c0_i32_1 = arith.constant 0 : i32
    return %c0_i32, %c0_i32_0 : i32, i32
  }
  func.func @transform_11(%arg0: i32) -> (i32, i32) {
    %c0_i32 = arith.constant 0 : i32
    %c0_i32_0 = arith.constant 0 : i32
    %c0_i32_1 = arith.constant 0 : i32
    return %c0_i32, %c0_i32_0 : i32, i32
  }
  func.func @transform_12(%arg0: i32) -> (i32, i32) {
    %c0_i32 = arith.constant 0 : i32
    %c0_i32_0 = arith.constant 0 : i32
    %c0_i32_1 = arith.constant 0 : i32
    return %c0_i32, %c0_i32_0 : i32, i32
  }
  func.func @transform_13(%arg0: i32) -> (i32, i32) {
    %c0_i32 = arith.constant 0 : i32
    %c0_i32_0 = arith.constant 0 : i32
    %c0_i32_1 = arith.constant 0 : i32
    return %c0_i32, %c0_i32_0 : i32, i32
  }
  func.func @transform_14(%arg0: i32) -> (i32, i32) {
    %c0_i32 = arith.constant 0 : i32
    %c0_i32_0 = arith.constant 0 : i32
    %c0_i32_1 = arith.constant 0 : i32
    return %c0_i32, %c0_i32_0 : i32, i32
  }
  func.func @transform_15(%arg0: i32) -> (i32, i32) {
    %c0_i32 = arith.constant 0 : i32
    %c0_i32_0 = arith.constant 0 : i32
    %c0_i32_1 = arith.constant 0 : i32
    return %c0_i32, %c0_i32_0 : i32, i32
  }
  func.func @transform_16(%arg0: i32) -> (i32, i32) {
    %c0_i32 = arith.constant 0 : i32
    %c0_i32_0 = arith.constant 0 : i32
    %c0_i32_1 = arith.constant 0 : i32
    return %c0_i32, %c0_i32_0 : i32, i32
  }
  func.func @transform_17(%arg0: i32) -> (i32, i32) {
    %c0_i32 = arith.constant 0 : i32
    %c0_i32_0 = arith.constant 0 : i32
    %c0_i32_1 = arith.constant 0 : i32
    return %c0_i32, %c0_i32_0 : i32, i32
  }
  func.func @transform_18(%arg0: i32) -> (i32, i32) {
    %c0_i32 = arith.constant 0 : i32
    %c0_i32_0 = arith.constant 0 : i32
    %c0_i32_1 = arith.constant 0 : i32
    return %c0_i32, %c0_i32_0 : i32, i32
  }
  func.func @transform_19(%arg0: i32) -> (i32, i32) {
    %c0_i32 = arith.constant 0 : i32
    %c0_i32_0 = arith.constant 0 : i32
    %c0_i32_1 = arith.constant 0 : i32
    return %c0_i32, %c0_i32_0 : i32, i32
  }
  func.func @transform_20(%arg0: i32) -> (i32, i32) {
    %c0_i32 = arith.constant 0 : i32
    %c0_i32_0 = arith.constant 0 : i32
    %c0_i32_1 = arith.constant 0 : i32
    return %c0_i32, %c0_i32_0 : i32, i32
  }
  func.func @transform_21(%arg0: i32) -> (i32, i32) {
    %c0_i32 = arith.constant 0 : i32
    %c0_i32_0 = arith.constant 0 : i32
    %c0_i32_1 = arith.constant 0 : i32
    return %c0_i32, %c0_i32_0 : i32, i32
  }
  func.func @transform_22(%arg0: i32) -> (i32, i32) {
    %c0_i32 = arith.constant 0 : i32
    %c0_i32_0 = arith.constant 0 : i32
    %c0_i32_1 = arith.constant 0 : i32
    return %c0_i32, %c0_i32_0 : i32, i32
  }
  func.func @transform_23(%arg0: i32) -> (i32, i32) {
    %c0_i32 = arith.constant 0 : i32
    %c0_i32_0 = arith.constant 0 : i32
    %c0_i32_1 = arith.constant 0 : i32
    return %c0_i32, %c0_i32_0 : i32, i32
  }
}

</mosaic_0001>

<bundles_post_ra>
// kernel: tpu_custom_call.1
= control target key start
LH: loop header
LB: loop body
LE: loop exit
PB: predicated region body
PF: predicated region fallthrough
CT: control target
= control target key end

     0   :  { %s2416_s0 = inlined_call_operand.hbm [shape: f32[12,12], index: 0, kind: input, shape index: {}]   ;;  %s2417_s1 = inlined_call_operand.hbm [shape: f32[12,9], index: 1, kind: input, shape index: {}]   ;;  %s2418_s2 = inlined_call_operand.vmem [shape: f32[2,12], index: 2, kind: input, shape index: {}]   ;;  %s2419_s3 = inlined_call_operand.hbm [shape: f32[9,32], index: 3, kind: input, shape index: {}]   ;;  %s2420_s4 = inlined_call_operand.hbm [shape: f32[9,32], index: 4, kind: input, shape index: {}]   ;;  %s2421_s5 = inlined_call_operand.vmem [shape: f32[1,32], index: 5, kind: input, shape index: {}]   ;;  %s2422_s6 = inlined_call_operand.vmem [shape: f32[1,32], index: 6, kind: input, shape index: {}]   ;;  %s2423_s7 = inlined_call_operand.vmem [shape: f32[1,32], index: 7, kind: input, shape index: {}]   ;;  %s2424_s8 = inlined_call_operand.hbm [shape: f32[32,64], index: 8, kind: input, shape index: {}]   ;;  %s2425_s9 = inlined_call_operand.hbm [shape: f32[32,64], index: 9, kind: input, shape index: {}]   ;;  %s2426_s10 = inlined_call_operand.vmem [shape: f32[1,64], index: 10, kind: input, shape index: {}]   ;;  %s2427_s11 = inlined_call_operand.vmem [shape: f32[1,64], index: 11, kind: input, shape index: {}]   ;;  %s2428_s12 = inlined_call_operand.vmem [shape: f32[1,64], index: 12, kind: input, shape index: {}]   ;;  %s2429_s13 = inlined_call_operand.hbm [shape: f32[64,128], index: 13, kind: input, shape index: {}]   ;;  %s2430_s14 = inlined_call_operand.hbm [shape: f32[64,128], index: 14, kind: input, shape index: {}]   ;;  %s2431_s15 = inlined_call_operand.vmem [shape: f32[1,128], index: 15, kind: input, shape index: {}]   ;;  %s2432_s16 = inlined_call_operand.vmem [shape: f32[1,128], index: 16, kind: input, shape index: {}]   ;;  %s2433_s17 = inlined_call_operand.vmem [shape: f32[1,128], index: 17, kind: input, shape index: {}]   ;;  %s2434_s18 = inlined_call_operand.hbm [shape: f32[128,256], index: 18, kind: input, shape index: {}]   ;;  %s2435_s19 = inlined_call_operand.hbm [shape: f32[128,256], index: 19, kind: input, shape index: {}]   ;;  %s2436_s20 = inlined_call_operand.vmem [shape: f32[1,256], index: 20, kind: input, shape index: {}]   ;;  %s2437_s21 = inlined_call_operand.vmem [shape: f32[1,256], index: 21, kind: input, shape index: {}]   ;;  %s2438_s22 = inlined_call_operand.vmem [shape: f32[1,256], index: 22, kind: input, shape index: {}]   ;;  %s2439_s23 = inlined_call_operand.hbm [shape: f32[2,256], index: 23, kind: output, shape index: {}]  }
   0x1   :  { %2440 = sst [smem:[#allocation27_spill]] %s2416_s0 }
   0x2   :  { %2441 = sst [smem:[#allocation28_spill]] %s2417_s1 }
   0x3   :  { %2442 = sst [smem:[#allocation29_spill]] %s2418_s2 }
   0x4   :  { %2443 = sst [smem:[#allocation30_spill]] %s2419_s3 }
   0x5   :  { %2444 = sst [smem:[#allocation31_spill]] %s2420_s4 }
   0x6   :  { %2445 = sst [smem:[#allocation32_spill]] %s2421_s5 }
   0x7   :  { %2446 = sst [smem:[#allocation33_spill]] %s2422_s6 }
   0x8   :  { %2447 = sst [smem:[#allocation34_spill]] %s2423_s7 }
   0x9   :  { %28 = vsyncpa [#allocation3], 0 }
   0xa   :  { %29 = vsyncpa [#allocation6], 0 }
   0xb   :  { %30 = vsyncpa [#allocation9], 0 }
   0xc   :  { %31 = vsyncpa [#allocation12], 0 }
   0xd   :  { %32 = vsyncpa [#allocation15], 0 }
   0xe   :  { %33 = vsyncpa [#allocation18], 0 }
   0xf   :  { %34 = vsyncpa [#allocation4], 0  ;;  %s2107_s4 = smov [#allocation5]   ;;  %s2108_s24 = smov [#allocation8]  }
  0x10   :  { %s52_s30 = sshll.u32 %s2107_s4, 4  ;;  %s78_s25 = sshll.u32 %s2108_s24, 4  ;;  %s53_s30 = int_to_ptr.vmem [resolvable:$true] %s52_s30  ;;  %s79_s25 = int_to_ptr.vmem [resolvable:$true] %s78_s25 }
  0x11   :  { %s1881_s5 = scalar_lea.vmem %s53_s30, 256  ;;  %p1886_p1 = scmp.lt.s32.totalorder %s53_s30, %s53_s30 }
  0x12   :  { %p1882_p0 = scmp.ne.s32.totalorder %s53_s30, %s1881_s5  ;;  %p1887_p2 = scmp.lt.s32.totalorder %s1881_s5, %s1881_s5 }
  0x14   :  { %p1888_p3 = por %p1887_p2, %p1886_p1 }
  0x16   :  { %p1889_p4 = pnand %p1888_p3, %p1882_p0 }
  0x18   :  { %1892 = shalt.err (!%p1889_p4)
}
  0x19   :  { %s2109_s1 = smov 128   ;;  %s2110_s26 = smov 8  }
  0x1a   :  { %s2448_s27 = sld [smem:[#allocation28_spill]]  ;;  %s1901_s7 = scalar_lea.vmem %s79_s25, 256 }
  0x1b   :  { %p1902_p5 = scmp.ne.s32.totalorder %s79_s25, %s1901_s7  ;;  %p1906_p6 = scmp.lt.s32.totalorder %s79_s25, %s79_s25 }
  0x1c   :  { %p1907_p7 = scmp.lt.s32.totalorder %s1901_s7, %s1901_s7 }
  0x1e   :  { %p1908_p8 = por %p1907_p7, %p1906_p6 }
  0x20   :  { %58 = dma.hbm_to_vmem [thread:$0]  %s2448_s27, 256, %s53_s30, [#allocation6], %s2109_s1, %s2109_s1, %s2110_s26  }
  0x21   :  { %p1909_p9 = pnand %p1908_p8, %p1902_p5 }
  0x23   :  { %1912 = shalt.err (!%p1909_p9)
}
  0x24   :  { %s2449_s3 = sld [smem:[#allocation31_spill]]  ;;  %s2111_s0 = smov [#allocation11]  }
  0x25   :  { %s108_s4 = sshll.u32 %s2111_s0, 4  ;;  %s2112_s24 = smov [#allocation14]   ;;  %s109_s4 = int_to_ptr.vmem [resolvable:$true] %s108_s4 }
  0x26   :  { %s138_s5 = sshll.u32 %s2112_s24, 4  ;;  %s1921_s30 = scalar_lea.vmem %s109_s4, 512  ;;  %s139_s5 = int_to_ptr.vmem [resolvable:$true] %s138_s5 }
  0x27   :  { %p1922_p10 = scmp.ne.s32.totalorder %s109_s4, %s1921_s30  ;;  %p1926_p11 = scmp.lt.s32.totalorder %s109_s4, %s109_s4 }
  0x28   :  { %p1927_p12 = scmp.lt.s32.totalorder %s1921_s30, %s1921_s30 }
  0x2a   :  { %84 = dma.hbm_to_vmem [thread:$0]  %s2449_s3, 256, %s79_s25, [#allocation9], %s2109_s1, %s2109_s1, %s2110_s26  }
  0x2b   :  { %p1928_p13 = por %p1927_p12, %p1926_p11 }
  0x2d   :  { %p1929_p0 = pnand %p1928_p13, %p1922_p10 }
  0x2f   :  { %1932 = shalt.err (!%p1929_p0)
}
  0x30   :  { %114 = dma.hbm_to_vmem [thread:$0]  %s2425_s9, 512, %s109_s4, [#allocation12], %s2109_s1, %s2109_s1, %s2110_s26  }
  0x31   :  { %s1941_s25 = scalar_lea.vmem %s139_s5, 1024  ;;  %p1946_p2 = scmp.lt.s32.totalorder %s139_s5, %s139_s5 }
  0x32   :  { %p1942_p1 = scmp.ne.s32.totalorder %s139_s5, %s1941_s25  ;;  %p1947_p3 = scmp.lt.s32.totalorder %s1941_s25, %s1941_s25 }
  0x34   :  { %p1948_p4 = por %p1947_p3, %p1946_p2 }
  0x36   :  { %p1949_p5 = pnand %p1948_p4, %p1942_p1 }
  0x38   :  { %1952 = shalt.err (!%p1949_p5)
}
  0x39   :  { %144 = dma.hbm_to_vmem [thread:$0]  %s2430_s14, 1024, %s139_s5, [#allocation15], %s2109_s1, %s2109_s1, %s2110_s26  }
  0x3a   :  { %s2113_s28 = smov [#allocation2]   ;;  %s2114_s3 = smov [#allocation7]  }
  0x3b   :  { %s40_s29 = sshll.u32 %s2113_s28, 4  ;;  %s66_s0 = sshll.u32 %s2114_s3, 4  ;;  %s41_s29 = int_to_ptr.vmem [resolvable:$true] %s40_s29  ;;  %s67_s0 = int_to_ptr.vmem [resolvable:$true] %s66_s0 }
  0x3c   :  { %s1961_s9 = scalar_lea.vmem %s41_s29, 256  ;;  %p1966_p7 = scmp.lt.s32.totalorder %s41_s29, %s41_s29 }
  0x3d   :  { %p1962_p6 = scmp.ne.s32.totalorder %s41_s29, %s1961_s9  ;;  %p1967_p8 = scmp.lt.s32.totalorder %s1961_s9, %s1961_s9 }
  0x3f   :  { %p1968_p9 = por %p1967_p8, %p1966_p7 }
  0x41   :  { %p1969_p10 = pnand %p1968_p9, %p1962_p6 }
  0x43   :  { %1972 = shalt.err (!%p1969_p10)
}
  0x44   :  { %s2450_s30 = sld [smem:[#allocation27_spill]]  ;;  %s1981_s14 = scalar_lea.vmem %s67_s0, 256 }
  0x45   :  { %p1982_p11 = scmp.ne.s32.totalorder %s67_s0, %s1981_s14  ;;  %p1986_p12 = scmp.lt.s32.totalorder %s67_s0, %s67_s0 }
  0x46   :  { %p1987_p13 = scmp.lt.s32.totalorder %s1981_s14, %s1981_s14 }
  0x48   :  { %p1988_p0 = por %p1987_p13, %p1986_p12 }
  0x4a   :  { %46 = dma.hbm_to_vmem [thread:$0]  %s2450_s30, 256, %s41_s29, [#allocation3], %s2109_s1, %s2109_s1, %s2110_s26  }
  0x4b   :  { %p1989_p1 = pnand %p1988_p0, %p1982_p11 }
  0x4d   :  { %1992 = shalt.err (!%p1989_p1)
}
  0x4e   :  { %s2451_s6 = sld [smem:[#allocation30_spill]]  ;;  %s2115_s25 = smov [#allocation10]  }
  0x4f   :  { %s96_s27 = sshll.u32 %s2115_s25, 4  ;;  %s2116_s7 = smov [#allocation13]   ;;  %s97_s27 = int_to_ptr.vmem [resolvable:$true] %s96_s27 }
  0x50   :  { %s126_s28 = sshll.u32 %s2116_s7, 4  ;;  %s2001_s29 = scalar_lea.vmem %s97_s27, 512  ;;  %s127_s28 = int_to_ptr.vmem [resolvable:$true] %s126_s28 }
  0x51   :  { %p2002_p2 = scmp.ne.s32.totalorder %s97_s27, %s2001_s29  ;;  %p2006_p3 = scmp.lt.s32.totalorder %s97_s27, %s97_s27 }
  0x52   :  { %p2007_p4 = scmp.lt.s32.totalorder %s2001_s29, %s2001_s29 }
  0x54   :  { %72 = dma.hbm_to_vmem [thread:$0]  %s2451_s6, 256, %s67_s0, [#allocation6], %s2109_s1, %s2109_s1, %s2110_s26  }
  0x55   :  { %p2008_p5 = por %p2007_p4, %p2006_p3 }
  0x57   :  { %p2009_p6 = pnand %p2008_p5, %p2002_p2 }
  0x59   :  { %2012 = shalt.err (!%p2009_p6)
}
  0x5a   :  { %102 = dma.hbm_to_vmem [thread:$0]  %s2424_s8, 512, %s97_s27, [#allocation9], %s2109_s1, %s2109_s1, %s2110_s26  }
  0x5b   :  { %s2021_s0 = scalar_lea.vmem %s127_s28, 1024  ;;  %p2026_p8 = scmp.lt.s32.totalorder %s127_s28, %s127_s28 }
  0x5c   :  { %p2022_p7 = scmp.ne.s32.totalorder %s127_s28, %s2021_s0  ;;  %p2027_p9 = scmp.lt.s32.totalorder %s2021_s0, %s2021_s0 }
  0x5e   :  { %p2028_p10 = por %p2027_p9, %p2026_p8 }
  0x60   :  { %p2029_p11 = pnand %p2028_p10, %p2022_p7 }
  0x62   :  { %2032 = shalt.err (!%p2029_p11)
}
  0x63   :  { %132 = dma.hbm_to_vmem [thread:$0]  %s2429_s13, 1024, %s127_s28, [#allocation12], %s2109_s1, %s2109_s1, %s2110_s26  }
  0x64   :  { %s2117_s30 = smov [#allocation16]  }
  0x65   :  { %s156_s14 = sshll.u32 %s2117_s30, 4  ;;  %s157_s14 = int_to_ptr.vmem [resolvable:$true] %s156_s14 }
  0x66   :  { %s2041_s5 = scalar_lea.vmem %s157_s14, 4096  ;;  %p2046_p13 = scmp.lt.s32.totalorder %s157_s14, %s157_s14 }
  0x67   :  { %p2042_p12 = scmp.ne.s32.totalorder %s157_s14, %s2041_s5  ;;  %p2047_p0 = scmp.lt.s32.totalorder %s2041_s5, %s2041_s5 }
  0x69   :  { %p2048_p1 = por %p2047_p0, %p2046_p13 }
  0x6b   :  { %p2049_p2 = pnand %p2048_p1, %p2042_p12 }
  0x6d   :  { %2052 = shalt.err (!%p2049_p2)
}
  0x6e   :  { %s2118_s8 = smov 256   ;;  %s2119_s2 = smov 16  }
  0x6f   :  { %162 = dma.hbm_to_vmem [thread:$0]  %s2434_s18, 4096, %s157_s14, [#allocation15], %s2118_s8, %s2118_s8, %s2119_s2  }
  0x70   :  { %s2120_s27 = smov [#allocation17]  }
  0x71   :  { %s168_s7 = sshll.u32 %s2120_s27, 4  ;;  %s169_s7 = int_to_ptr.vmem [resolvable:$true] %s168_s7 }
  0x72   :  { %s2061_s13 = scalar_lea.vmem %s169_s7, 4096  ;;  %p2066_p4 = scmp.lt.s32.totalorder %s169_s7, %s169_s7 }
  0x73   :  { %p2062_p3 = scmp.ne.s32.totalorder %s169_s7, %s2061_s13  ;;  %p2067_p5 = scmp.lt.s32.totalorder %s2061_s13, %s2061_s13 }
  0x75   :  { %p2068_p6 = por %p2067_p5, %p2066_p4 }
  0x77   :  { %p2069_p7 = pnand %p2068_p6, %p2062_p3 }
  0x79   :  { %2072 = shalt.err (!%p2069_p7)
}
  0x7a   :  { %174 = dma.hbm_to_vmem [thread:$0]  %s2435_s19, 4096, %s169_s7, [#allocation18], %s2118_s8, %s2118_s8, %s2119_s2  }
  0x7b   :  { %2093 = dma.done.wait [#allocation3], 256  }
  0x7c   :  { %2094 = vsyncadd [#allocation3], 4294967040 }
  0x7d   :  { %2095 = dma.done.wait [#allocation6], 512  }
  0x7e   :  { %2096 = vsyncadd [#allocation6], 4294966784 }
  0x7f   :  { %2097 = dma.done.wait [#allocation9], 768  }
  0x80   :  { %2098 = vsyncadd [#allocation9], 4294966528 }
  0x81   :  { %2099 = dma.done.wait [#allocation12], 1536  }
  0x82   :  { %2100 = vsyncadd [#allocation12], 4294965760 }
  0x83   :  { %2101 = dma.done.wait [#allocation15], 5120  }
  0x84   :  { %2102 = vsyncadd [#allocation15], 4294962176 }
  0x85   :  { %2103 = dma.done.wait [#allocation18], 4096  }
  0x86   :  { %2104 = vsyncadd [#allocation18], 4294963200  ;;  %vm222_vm0 = vcmask 1043456   ;;  %vm215_vm1 = vcmask 97280   ;;  %vm311_vm2 = vcmask 1040384   ;;  %v213_v1 = vld [vmem:[#allocation5] sm:$0xff] }
  0x87   :  { %v214_v0 = vld [vmem:[#allocation5 + $0x8] sm:$0xf]  ;;  %v2297_v2 = vld [vmem:[#allocation2] sm:$0xff]  ;;  %v2303_v4 = vld [vmem:[#allocation2 + $0x8] sm:$0xf]  ;;  %vm305_vm3 = vcmask 72704  }
  0x88   :  { %1739 = vmatprep.subr.msk.mxu0 %vm222_vm0, %v214_v0  ;;  %1743 = vmatprep.mubr.msk.f32.mxu0 %vm215_vm1, %v2297_v2  ;;  %v304_v3 = vld [vmem:[#allocation8 + $0x8] sm:$0x1]  ;;  %v303_v5 = vld [vmem:[#allocation8] sm:$0xff]  ;;  %v302_v6 = vld [vmem:[#allocation7 + $0x8] sm:$0x1]  ;;  %s2452_s28 = sld [smem:[#allocation32_spill]] }
  0x89   :  { %1740 = vmatpush3.msk.msra.mxu0 %vm222_vm0, %v214_v0  ;;  %1746 = vmatprep.subr.msk.mxu1 %vm311_vm2, %v304_v3  ;;  %v301_v7 = vld [vmem:[#allocation7] sm:$0xff]  ;;  %vm487_vm4 = vcmask 257024   ;;  %vm483_vm5 = vcmask 261120   ;;  %v617_v31 = vld [vmem:[#allocation11 + $0x18] sm:$0xff]  ;;  %v616_v32 = vld [vmem:[#allocation11 + $0x10] sm:$0xff]  ;;  %s2453_s9 = sld [smem:[#allocation33_spill]] }
  0x8a   :  { %1741 = vmatprep.subr.mxu0 %v213_v1  ;;  %1747 = vmatpush3.msk.msra.mxu1 %vm311_vm2, %v304_v3  ;;  %v615_v33 = vld [vmem:[#allocation11 + $0x8] sm:$0xff]  ;;  %v614_v34 = vld [vmem:[#allocation11] sm:$0xff]  ;;  %s2454_s24 = sld [smem:[#allocation34_spill]]  ;;  %v613_v53 = vld [vmem:[#allocation10 + $0x18] sm:$0xff]  ;;  %vm792_vm6 = vcmask 519168   ;;  %vm788_vm7 = vcmask 523264  }
  0x8b   :  { %1742 = vmatpush3.msra.mxu0 %v213_v1  ;;  %1748 = vmatprep.subr.mxu1 %v303_v5  ;;  %v612_v54 = vld [vmem:[#allocation10 + $0x10] sm:$0xff]  ;;  %v611_v55 = vld [vmem:[#allocation10 + $0x8] sm:$0xff]  ;;  %v610_v56 = vld [vmem:[#allocation10] sm:$0xff]  ;;  %s2455_s26 = sld [smem:[#allocation29_spill]]  ;;  %s2122_s18 = smov [#allocation19]  }
  0x8c   :  { %1744 = vmatmul.mubr.msk.f32.vlgmr.msra.gmra.mxu0 %vm215_vm1, %v2303_v4  ;;  %1753 = vmatprep.subr.msk.mxu0 %vm311_vm2, %v302_v6  ;;  %v1663_v61 = vld [vmem:[%s2426_s10] ss:$0 sm:$0xff]  ;;  %s1630_s19 = sshll.u32 %s2122_s18, 4  ;;  %s1631_s19 = int_to_ptr.vmem [resolvable:$true] %s1630_s19 }
  0x8d   :  { %1749 = vmatpush3.msra.mxu1 %v303_v5  ;;  %1750 = vmatprep.mubr.msk.f32.mxu1 %vm305_vm3, %v213_v1  ;;  %p2078_p9 = scmp.lt.s32.totalorder %s1631_s19, %s1631_s19 }
  0x8e   :  { %1754 = vmatpush3.msk.msra.mxu0 %vm311_vm2, %v302_v6  ;;  %1751 = vmatmul.mubr.msk.f32.vlgmr.msra.gmra.mxu1 %vm305_vm3, %v214_v0  ;;  %v1653_v12 = vld [vmem:[%s2452_s28] ss:$0 sm:$0xff]  ;;  %s2073_s28 = scalar_lea.vmem %s1631_s19, 64 }
  0x8f   :  { %1755 = vmatprep.subr.mxu0 %v301_v7  ;;  %1764 = vmatprep.mubr.msk.f32.mxu1 %vm215_vm1, %v2297_v2  ;;  %v1654_v42 = vld [vmem:[%s2453_s9] ss:$0 sm:$0xff]  ;;  %p2074_p8 = scmp.ne.s32.totalorder %s1631_s19, %s2073_s28  ;;  %p2079_p10 = scmp.lt.s32.totalorder %s2073_s28, %s2073_s28 }
  0x90   :  { %1756 = vmatpush3.msra.mxu0 %v301_v7  ;;  %v1655_v44 = vld [vmem:[%s2454_s24] ss:$0 sm:$0xff] }
  0x91   :  { %1767 = vmatprep.subr.mxu0 %v617_v31  ;;  %p2080_p11 = por %p2079_p10, %p2078_p9 }
  0x93   :  { %p2081_p12 = pnand %p2080_p11, %p2074_p8 }
 0x14c   :  { %v1745_v8 = vpop.f32.mrf.mxu0 }
 0x14e   :  { %v292_v9 = vpop.f32.mrf.mxu0  ;;  %v1752_v10 = vpop.f32.mrf.mxu1 }
 0x14f   :  { %1757 = vmatprep.mubr.msk.f32.mxu0 %vm305_vm3, %v292_v9 }
 0x150   :  { %1758 = vmatmul.mubr.msk.f32.vlgmr.msra.gmra.mxu0 %vm305_vm3, %v1745_v8  ;;  %v381_v14 = vpop.f32.mrf.mxu1 }
 0x151   :  { %1768 = vmatpush3.msra.mxu0 %v617_v31 }
 0x152   :  { %1769 = vmatprep.subr.mxu0 %v616_v32 }
 0x153   :  { %1770 = vmatpush3.msra.mxu0 %v616_v32 }
 0x154   :  { %1771 = vmatprep.subr.mxu0 %v615_v33 }
 0x155   :  { %1772 = vmatpush3.msra.mxu0 %v615_v33  ;;  %v1664_v33 = vld [vmem:[%s2427_s11] ss:$0 sm:$0xff] }
 0x156   :  { %1773 = vmatprep.subr.mxu0 %v614_v34 }
 0x157   :  { %1774 = vmatpush3.msra.mxu0 %v614_v34 }
 0x210   :  { %v1759_v11 = vpop.f32.mrf.mxu0 }
 0x211   :  { %v471_v13 = vadd.f32 %v1759_v11, %v1752_v10 }
 0x212   :  { %v465_v15 = vpop.f32.mrf.mxu0 }
 0x213   :  { %v466_v16 = vadd.f32 %v465_v15, %v381_v14  ;;  %v482_v17 = vadd.f32 %v1653_v12, %v471_v13 }
 0x215   :  { %v488_v18 = vsel %vm487_vm4, %v482_v17, 0.0  ;;  %v481_v19 = vadd.f32 %v1653_v12, %v466_v16 }
 0x216   :  { %489 = vadd.xlane.f32.xlu0 %v488_v18  ;;  %v930_v18 = vld [vmem:[#allocation14 + $0x38] sm:$0xff] }
 0x217   :  { %v484_v20 = vsel %vm483_vm5, %v481_v19, 0.0 }
 0x21a   :  { %485 = vadd.xlane.f32.xlu0 %v484_v20  ;;  %v928_v20 = vld [vmem:[#allocation14 + $0x28] sm:$0xff] }
 0x29f   :  { %v490_v21 = vpop.xlane.xlu0 %489 }
 0x2a0   :  { %v493_v22 = vmul.f32 0.03125, %v490_v21  ;;  %v927_v21 = vld [vmem:[#allocation14 + $0x20] sm:$0xff] }
 0x2a2   :  { %v495_v23 = vsub.f32 %v482_v17, %v493_v22  ;;  %v926_v22 = vld [vmem:[#allocation14 + $0x18] sm:$0xff] }
 0x2a3   :  { %v486_v24 = vpop.xlane.xlu0 %485 }
 0x2a4   :  { %v492_v25 = vmul.f32 0.03125, %v486_v24  ;;  %v497_v26 = vmul.f32 %v495_v23, %v495_v23  ;;  %v924_v24 = vld [vmem:[#allocation14 + $0x8] sm:$0xff] }
 0x2a6   :  { %v494_v27 = vsub.f32 %v481_v19, %v492_v25  ;;  %v501_v28 = vsel %vm487_vm4, %v497_v26, 0.0  ;;  %v929_v19 = vld [vmem:[#allocation14 + $0x30] sm:$0xff]  ;;  %v923_v25 = vld [vmem:[#allocation14] sm:$0xff] }
 0x2a7   :  { %502 = vadd.xlane.f32.xlu1 %v501_v28 }
 0x2a8   :  { %v496_v29 = vmul.f32 %v494_v27, %v494_v27 }
 0x2aa   :  { %v498_v30 = vsel %vm483_vm5, %v496_v29, 0.0 }
 0x2ab   :  { %499 = vadd.xlane.f32.xlu1 %v498_v30 }
 0x330   :  { %v503_v35 = vpop.xlane.xlu1 %502 }
 0x331   :  { %v505_v36 = vmul.f32 0.03125, %v503_v35 }
 0x333   :  { %v507_v37 = vadd.f32 1e-05, %v505_v36  ;;  %v1665_v36 = vld [vmem:[%s2428_s12] ss:$0 sm:$0xff] }
 0x334   :  { %v500_v38 = vpop.xlane.xlu1 %499 }
 0x335   :  { %1857 = vrsqrt.f32 %v507_v37  ;;  %v504_v39 = vmul.f32 0.03125, %v500_v38 }
 0x337   :  { %v506_v40 = vadd.f32 1e-05, %v504_v39 }
 0x339   :  { %1859 = vrsqrt.f32 %v506_v40 }
 0x342   :  { %v1858_v41 = vpop.eup %1857 }
 0x343   :  { %v511_v43 = vmul.f32 %v1858_v41, %v495_v23  ;;  %v925_v23 = vld [vmem:[#allocation14 + $0x10] sm:$0xff] }
 0x345   :  { %v520_v45 = vmul.f32 %v1654_v42, %v511_v43 }
 0x346   :  { %v1860_v46 = vpop.eup %1859 }
 0x347   :  { %v529_v47 = vadd.f32 %v1655_v44, %v520_v45  ;;  %v510_v48 = vmul.f32 %v1860_v46, %v494_v27  ;;  %v921_v45 = vld [vmem:[#allocation13 + $0x30] sm:$0xff]  ;;  %v920_v46 = vld [vmem:[#allocation13 + $0x28] sm:$0xff] }
 0x349   :  { %v531_v49 = vmax.f32 %v529_v47, 0.0  ;;  %v519_v50 = vmul.f32 %v1654_v42, %v510_v48  ;;  %v919_v47 = vld [vmem:[#allocation13 + $0x20] sm:$0xff]  ;;  %v918_v48 = vld [vmem:[#allocation13 + $0x18] sm:$0xff] }
 0x34b   :  { %1760 = vmatprep.subr.msk.mxu1 %vm222_vm0, %v531_v49  ;;  %v528_v51 = vadd.f32 %v1655_v44, %v519_v50  ;;  %v922_v44 = vld [vmem:[#allocation13 + $0x38] sm:$0xff]  ;;  %v916_v50 = vld [vmem:[#allocation13 + $0x8] sm:$0xff] }
 0x34c   :  { %1761 = vmatpush3.msk.msra.mxu1 %vm222_vm0, %v531_v49 }
 0x34d   :  { %v530_v52 = vmax.f32 %v528_v51, 0.0  ;;  %v915_v51 = vld [vmem:[#allocation13] sm:$0xff] }
 0x34f   :  { %1762 = vmatprep.subr.mxu1 %v530_v52  ;;  %1775 = vmatprep.mubr.msk.f32.mxu0 %vm483_vm5, %v530_v52 }
 0x350   :  { %1763 = vmatpush3.msra.mxu1 %v530_v52  ;;  %1776 = vmatmul.mubr.msk.f32.vlgmr.msra.gmra.mxu0 %vm483_vm5, %v531_v49  ;;  %v917_v49 = vld [vmem:[#allocation13 + $0x10] sm:$0xff] }
 0x351   :  { %1765 = vmatmul.mubr.msk.f32.vlgmr.msra.gmra.mxu1 %vm215_vm1, %v2303_v4  ;;  %1778 = vmatprep.subr.mxu1 %v613_v53 }
 0x352   :  { %1779 = vmatpush3.msra.mxu1 %v613_v53  ;;  %1793 = vmatprep.mubr.msk.f32.mxu0 %vm215_vm1, %v2297_v2 }
 0x353   :  { %1780 = vmatprep.subr.mxu1 %v612_v54 }
 0x354   :  { %1781 = vmatpush3.msra.mxu1 %v612_v54 }
 0x355   :  { %1782 = vmatprep.subr.mxu1 %v611_v55 }
 0x356   :  { %1783 = vmatpush3.msra.mxu1 %v611_v55  ;;  %v1673_v55 = vld [vmem:[%s2431_s15] ss:$0 sm:$0xff] }
 0x357   :  { %1784 = vmatprep.subr.mxu1 %v610_v56 }
 0x358   :  { %1785 = vmatpush3.msra.mxu1 %v610_v56 }
 0x359   :  { %1796 = vmatprep.subr.mxu1 %v930_v18 }
 0x410   :  { %v1777_v59 = vpop.f32.mrf.mxu0 }
 0x411   :  { %v1766_v57 = vpop.f32.mrf.mxu1 }
 0x412   :  { %v689_v63 = vpop.f32.mrf.mxu0 }
 0x413   :  { %v601_v58 = vpop.f32.mrf.mxu1 }
 0x414   :  { %1786 = vmatprep.mubr.msk.f32.mxu1 %vm483_vm5, %v601_v58 }
 0x415   :  { %1787 = vmatmul.mubr.msk.f32.vlgmr.msra.gmra.mxu1 %vm483_vm5, %v1766_v57 }
 0x416   :  { %1797 = vmatpush3.msra.mxu1 %v930_v18  ;;  %v1279_v18 = vld [vmem:[#allocation17 + $0xb8] sm:$0xff] }
 0x417   :  { %1798 = vmatprep.subr.mxu1 %v929_v19 }
 0x418   :  { %1799 = vmatpush3.msra.mxu1 %v929_v19  ;;  %v1278_v19 = vld [vmem:[#allocation17 + $0xb0] sm:$0xff] }
 0x419   :  { %1800 = vmatprep.subr.mxu1 %v928_v20 }
 0x41a   :  { %1801 = vmatpush3.msra.mxu1 %v928_v20  ;;  %v1277_v20 = vld [vmem:[#allocation17 + $0xa8] sm:$0xff] }
 0x41b   :  { %1802 = vmatprep.subr.mxu1 %v927_v21 }
 0x41c   :  { %1803 = vmatpush3.msra.mxu1 %v927_v21  ;;  %v1276_v21 = vld [vmem:[#allocation17 + $0xa0] sm:$0xff] }
 0x41d   :  { %1804 = vmatprep.subr.mxu1 %v926_v22 }
 0x41e   :  { %1805 = vmatpush3.msra.mxu1 %v926_v22  ;;  %v1275_v22 = vld [vmem:[#allocation17 + $0x98] sm:$0xff] }
 0x41f   :  { %1806 = vmatprep.subr.mxu1 %v925_v23 }
 0x420   :  { %1807 = vmatpush3.msra.mxu1 %v925_v23  ;;  %v1274_v23 = vld [vmem:[#allocation17 + $0x90] sm:$0xff] }
 0x421   :  { %1808 = vmatprep.subr.mxu1 %v924_v24 }
 0x422   :  { %1809 = vmatpush3.msra.mxu1 %v924_v24  ;;  %v1273_v24 = vld [vmem:[#allocation17 + $0x88] sm:$0xff] }
 0x423   :  { %1810 = vmatprep.subr.mxu1 %v923_v25 }
 0x424   :  { %1811 = vmatpush3.msra.mxu1 %v923_v25  ;;  %v2121_v25 = vmov 0.0  }
 0x4d5   :  { %v1788_v60 = vpop.f32.mrf.mxu1 }
 0x4d6   :  { %v776_v62 = vadd.f32 %v1788_v60, %v1777_v59 }
 0x4d7   :  { %v770_v0 = vpop.f32.mrf.mxu1 }
 0x4d8   :  { %v771_v1 = vadd.f32 %v770_v0, %v689_v63  ;;  %v787_v3 = vadd.f32 %v1663_v61, %v776_v62  ;;  %v1287_v63 = vld [vmem:[#allocation17 + $0xf8] sm:$0xff]  ;;  %v1286_v0 = vld [vmem:[#allocation17 + $0xf0] sm:$0xff] }
 0x4da   :  { %v793_v5 = vsel %vm792_vm6, %v787_v3, 0.0  ;;  %v786_v6 = vadd.f32 %v1663_v61, %v771_v1  ;;  %v1285_v1 = vld [vmem:[#allocation17 + $0xe8] sm:$0xff] }
 0x4db   :  { %794 = vadd.xlane.f32.xlu0 %v793_v5  ;;  %v1283_v5 = vld [vmem:[#allocation17 + $0xd8] sm:$0xff] }
 0x4dc   :  { %v789_v7 = vsel %vm788_vm7, %v786_v6, 0.0 }
 0x4dd   :  { %790 = vadd.xlane.f32.xlu1 %v789_v7 }
 0x564   :  { %v795_v8 = vpop.xlane.xlu0 %794 }
 0x565   :  { %v798_v9 = vmul.f32 0.015625, %v795_v8 }
 0x566   :  { %v791_v10 = vpop.xlane.xlu1 %790 }
 0x567   :  { %v800_v11 = vsub.f32 %v787_v3, %v798_v9  ;;  %v797_v12 = vmul.f32 0.015625, %v791_v10  ;;  %v1284_v3 = vld [vmem:[#allocation17 + $0xe0] sm:$0xff] }
 0x569   :  { %v799_v13 = vsub.f32 %v786_v6, %v797_v12  ;;  %v802_v14 = vmul.f32 %v800_v11, %v800_v11  ;;  %v1282_v6 = vld [vmem:[#allocation17 + $0xd0] sm:$0xff] }
 0x56b   :  { %v806_v15 = vsel %vm792_vm6, %v802_v14, 0.0  ;;  %v801_v16 = vmul.f32 %v799_v13, %v799_v13 }
 0x56c   :  { %807 = vadd.xlane.f32.xlu0 %v806_v15 }
 0x56d   :  { %v803_v17 = vsel %vm788_vm7, %v801_v16, 0.0  ;;  %v1281_v16 = vld [vmem:[#allocation17 + $0xc8] sm:$0xff] }
 0x56e   :  { %804 = vadd.xlane.f32.xlu1 %v803_v17  ;;  %v1280_v17 = vld [vmem:[#allocation17 + $0xc0] sm:$0xff] }
 0x5f5   :  { %v808_v26 = vpop.xlane.xlu0 %807 }
 0x5f6   :  { %v810_v27 = vmul.f32 0.015625, %v808_v26  ;;  %v1272_v26 = vld [vmem:[#allocation17 + $0x80] sm:$0xff] }
 0x5f7   :  { %v805_v28 = vpop.xlane.xlu1 %804 }
 0x5f8   :  { %v812_v29 = vadd.f32 1e-05, %v810_v27  ;;  %v809_v30 = vmul.f32 0.015625, %v805_v28  ;;  %v1271_v27 = vld [vmem:[#allocation17 + $0x78] sm:$0xff]  ;;  %v1270_v28 = vld [vmem:[#allocation17 + $0x70] sm:$0xff] }
 0x5fa   :  { %1861 = vrsqrt.f32 %v812_v29  ;;  %v811_v31 = vadd.f32 1e-05, %v809_v30  ;;  %v1269_v29 = vld [vmem:[#allocation17 + $0x68] sm:$0xff]  ;;  %v1268_v30 = vld [vmem:[#allocation17 + $0x60] sm:$0xff] }
 0x5fc   :  { %1863 = vrsqrt.f32 %v811_v31  ;;  %v1267_v31 = vld [vmem:[#allocation17 + $0x58] sm:$0xff] }
 0x607   :  { %v1862_v32 = vpop.eup %1861 }
 0x608   :  { %v816_v34 = vmul.f32 %v1862_v32, %v800_v11  ;;  %v1266_v32 = vld [vmem:[#allocation17 + $0x50] sm:$0xff] }
 0x609   :  { %v1864_v35 = vpop.eup %1863 }
 0x60a   :  { %v825_v37 = vmul.f32 %v1664_v33, %v816_v34  ;;  %v815_v38 = vmul.f32 %v1864_v35, %v799_v13  ;;  %v1264_v34 = vld [vmem:[#allocation17 + $0x40] sm:$0xff]  ;;  %v1263_v35 = vld [vmem:[#allocation17 + $0x38] sm:$0xff] }
 0x60c   :  { %v834_v39 = vadd.f32 %v1665_v36, %v825_v37  ;;  %v824_v40 = vmul.f32 %v1664_v33, %v815_v38  ;;  %v1265_v33 = vld [vmem:[#allocation17 + $0x48] sm:$0xff]  ;;  %v1260_v38 = vld [vmem:[#allocation17 + $0x20] sm:$0xff] }
 0x60d   :  { %v1261_v37 = vld [vmem:[#allocation17 + $0x28] sm:$0xff] }
 0x60e   :  { %v836_v41 = vmax.f32 %v834_v39, 0.0  ;;  %v833_v42 = vadd.f32 %v1665_v36, %v824_v40  ;;  %v1262_v36 = vld [vmem:[#allocation17 + $0x30] sm:$0xff]  ;;  %v1259_v39 = vld [vmem:[#allocation17 + $0x18] sm:$0xff] }
 0x60f   :  { %v1258_v40 = vld [vmem:[#allocation17 + $0x10] sm:$0xff] }
 0x610   :  { %1789 = vmatprep.subr.msk.mxu0 %vm222_vm0, %v836_v41  ;;  %v835_v43 = vmax.f32 %v833_v42, 0.0  ;;  %v1256_v42 = vld [vmem:[#allocation17] sm:$0xff] }
 0x611   :  { %1790 = vmatpush3.msk.msra.mxu0 %vm222_vm0, %v836_v41 }
 0x612   :  { %1791 = vmatprep.subr.mxu0 %v835_v43  ;;  %1812 = vmatprep.mubr.msk.f32.mxu1 %vm788_vm7, %v835_v43 }
 0x613   :  { %1792 = vmatpush3.msra.mxu0 %v835_v43  ;;  %1813 = vmatmul.mubr.msk.f32.vlgmr.msra.gmra.mxu1 %vm788_vm7, %v836_v41  ;;  %v1257_v41 = vld [vmem:[#allocation17 + $0x8] sm:$0xff] }
 0x614   :  { %1794 = vmatmul.mubr.msk.f32.vlgmr.msra.gmra.mxu0 %vm215_vm1, %v2303_v4  ;;  %1815 = vmatprep.subr.mxu0 %v922_v44 }
 0x615   :  { %1816 = vmatpush3.msra.mxu0 %v922_v44  ;;  %1838 = vmatprep.mubr.msk.f32.mxu1 %vm215_vm1, %v2297_v2 }
 0x616   :  { %1817 = vmatprep.subr.mxu0 %v921_v45 }
 0x617   :  { %1818 = vmatpush3.msra.mxu0 %v921_v45 }
 0x618   :  { %1819 = vmatprep.subr.mxu0 %v920_v46 }
 0x619   :  { %1820 = vmatpush3.msra.mxu0 %v920_v46 }
 0x61a   :  { %1821 = vmatprep.subr.mxu0 %v919_v47 }
 0x61b   :  { %1822 = vmatpush3.msra.mxu0 %v919_v47 }
 0x61c   :  { %1823 = vmatprep.subr.mxu0 %v918_v48 }
 0x61d   :  { %1824 = vmatpush3.msra.mxu0 %v918_v48 }
 0x61e   :  { %1825 = vmatprep.subr.mxu0 %v917_v49 }
 0x61f   :  { %1826 = vmatpush3.msra.mxu0 %v917_v49 }
 0x620   :  { %1827 = vmatprep.subr.mxu0 %v916_v50 }
 0x621   :  { %1828 = vmatpush3.msra.mxu0 %v916_v50  ;;  %v1674_v50 = vld [vmem:[%s2432_s16] ss:$0 sm:$0xff] }
 0x622   :  { %1829 = vmatprep.subr.mxu0 %v915_v51 }
 0x623   :  { %1830 = vmatpush3.msra.mxu0 %v915_v51 }
 0x624   :  { %1288 = vmatprep.subr.mxu0 %v1287_v63  ;;  %v1252_v63 = vld [vmem:[#allocation16 + $0xe0] sm:$0xff] }
 0x6d3   :  { %v1814_v53 = vpop.f32.mrf.mxu1 }
 0x6d4   :  { %v1795_v2 = vpop.f32.mrf.mxu0 }
 0x6d5   :  { %v1002_v57 = vpop.f32.mrf.mxu1 }
 0x6d6   :  { %v906_v52 = vpop.f32.mrf.mxu0 }
 0x6d7   :  { %1831 = vmatprep.mubr.msk.f32.mxu0 %vm788_vm7, %v906_v52  ;;  %v1675_v52 = vld [vmem:[%s2433_s17] ss:$0 sm:$0xff] }
 0x6d8   :  { %1832 = vmatmul.mubr.msk.f32.vlgmr.msra.gmra.mxu0 %vm788_vm7, %v1795_v2 }
 0x6d9   :  { %1289 = vmatpush1.msra.mxu0 %v1286_v0  ;;  %1352 = vmatprep.mubr.f32.mxu0 %v2121_v25  ;;  %v1251_v0 = vld [vmem:[#allocation16 + $0xd8] sm:$0xff] }
 0x6da   :  { %1290 = vmatprep.subr.mxu0 %v1285_v1  ;;  %v1250_v1 = vld [vmem:[#allocation16 + $0xd0] sm:$0xff] }
 0x6db   :  { %1291 = vmatpush1.msra.mxu0 %v1284_v3  ;;  %v1249_v3 = vld [vmem:[#allocation16 + $0xc8] sm:$0xff] }
 0x6dc   :  { %1292 = vmatprep.subr.mxu0 %v1283_v5  ;;  %v1248_v5 = vld [vmem:[#allocation16 + $0xc0] sm:$0xff] }
 0x6dd   :  { %1293 = vmatpush1.msra.mxu0 %v1282_v6  ;;  %v1247_v6 = vld [vmem:[#allocation16 + $0xb8] sm:$0xff] }
 0x6de   :  { %1294 = vmatprep.subr.mxu0 %v1281_v16  ;;  %v1236_v16 = vld [vmem:[#allocation16 + $0x60] sm:$0xff] }
 0x6df   :  { %1295 = vmatpush1.msra.mxu0 %v1280_v17  ;;  %v1235_v17 = vld [vmem:[#allocation16 + $0x58] sm:$0xff] }
 0x6e0   :  { %1296 = vmatprep.subr.mxu0 %v1279_v18  ;;  %v1234_v18 = vld [vmem:[#allocation16 + $0x50] sm:$0xff] }
 0x6e1   :  { %1297 = vmatpush1.msra.mxu0 %v1278_v19  ;;  %v1233_v19 = vld [vmem:[#allocation16 + $0x48] sm:$0xff] }
 0x6e2   :  { %1298 = vmatprep.subr.mxu0 %v1277_v20  ;;  %v1232_v20 = vld [vmem:[#allocation16 + $0x40] sm:$0xff] }
 0x6e3   :  { %1299 = vmatpush1.msra.mxu0 %v1276_v21  ;;  %v1231_v21 = vld [vmem:[#allocation16 + $0x38] sm:$0xff] }
 0x6e4   :  { %1300 = vmatprep.subr.mxu0 %v1275_v22  ;;  %v1230_v22 = vld [vmem:[#allocation16 + $0x30] sm:$0xff] }
 0x6e5   :  { %1301 = vmatpush1.msra.mxu0 %v1274_v23  ;;  %v1229_v23 = vld [vmem:[#allocation16 + $0x28] sm:$0xff] }
 0x6e6   :  { %1302 = vmatprep.subr.mxu0 %v1273_v24  ;;  %v1228_v24 = vld [vmem:[#allocation16 + $0x20] sm:$0xff] }
 0x6e7   :  { %1303 = vmatpush1.msra.mxu0 %v1272_v26  ;;  %v1227_v26 = vld [vmem:[#allocation16 + $0x18] sm:$0xff] }
 0x6e8   :  { %1304 = vmatprep.subr.mxu0 %v1271_v27  ;;  %v1226_v27 = vld [vmem:[#allocation16 + $0x10] sm:$0xff] }
 0x6e9   :  { %1305 = vmatpush1.msra.mxu0 %v1270_v28  ;;  %v1225_v28 = vld [vmem:[#allocation16 + $0x8] sm:$0xff] }
 0x6ea   :  { %1306 = vmatprep.subr.mxu0 %v1269_v29  ;;  %v1224_v29 = vld [vmem:[#allocation16] sm:$0xff] }
 0x6eb   :  { %1307 = vmatpush1.msra.mxu0 %v1268_v30 }
 0x6ec   :  { %1308 = vmatprep.subr.mxu0 %v1267_v31 }
 0x6ed   :  { %1309 = vmatpush1.msra.mxu0 %v1266_v32  ;;  %v1444_v32 = vlaneseq }
 0x6ee   :  { %1310 = vmatprep.subr.mxu0 %v1265_v33 }
 0x6ef   :  { %1311 = vmatpush1.msra.mxu0 %v1264_v34  ;;  %v1445_v33 = vshrl.u32 %v1444_v32, 7 }
 0x6f0   :  { %1312 = vmatprep.subr.mxu0 %v1263_v35 }
 0x6f1   :  { %1313 = vmatpush1.msra.mxu0 %v1262_v36  ;;  %v2389_v35 = vsub.s32 0, %v1445_v33  ;;  %v1450_v36 = vsub.s32 1, %v1445_v33 }
 0x6f2   :  { %1314 = vmatprep.subr.mxu0 %v1261_v37 }
 0x6f3   :  { %1315 = vmatpush1.msra.mxu0 %v1260_v38  ;;  %v1442_v38 = vld [vmem:[%s2436_s20] sm:$0x3] }
 0x6f4   :  { %1316 = vmatprep.subr.mxu0 %v1259_v39 }
 0x6f5   :  { %1317 = vmatpush1.msra.mxu0 %v1258_v40 }
 0x6f6   :  { %1318 = vmatprep.subr.mxu0 %v1257_v41  ;;  %v1447_v41 = vrot.slane %v1442_v38, %v2389_v35 }
 0x6f7   :  { %1319 = vmatpush1.msra.mxu0 %v1256_v42  ;;  %v1451_v42 = vrot.slane %v1442_v38, %v1450_v36 }
 0x798   :  { %v1833_v54 = vpop.f32.mrf.mxu0 }
 0x799   :  { %v1089_v56 = vadd.f32 %v1833_v54, %v1814_v53 }
 0x79a   :  { %v1083_v58 = vpop.f32.mrf.mxu0 }
 0x79b   :  { %v1084_v59 = vadd.f32 %v1083_v58, %v1002_v57  ;;  %v1100_v60 = vadd.f32 %v1673_v55, %v1089_v56 }
 0x79d   :  { %v1103_v61 = vsel %vm222_vm0, %v1100_v60, 0.0  ;;  %v1099_v62 = vadd.f32 %v1673_v55, %v1084_v59 }
 0x79e   :  { %1104 = vadd.xlane.f32.xlu0 %v1103_v61  ;;  %v1254_v61 = vld [vmem:[#allocation16 + $0xf0] sm:$0xff] }
 0x79f   :  { %1101 = vadd.xlane.f32.xlu1 %v1099_v62 }
 0x827   :  { %v1105_v7 = vpop.xlane.xlu0 %1104 }
 0x828   :  { %v1108_v8 = vmul.f32 0.0078125, %v1105_v7  ;;  %v1102_v9 = vpop.xlane.xlu1 %1101  ;;  %v1246_v7 = vld [vmem:[#allocation16 + $0xb0] sm:$0xff] }
 0x829   :  { %v1107_v10 = vmul.f32 0.0078125, %v1102_v9  ;;  %v1243_v9 = vld [vmem:[#allocation16 + $0x98] sm:$0xff] }
 0x82a   :  { %v2363_v11 = vsub.f32 %v1100_v60, %v1108_v8  ;;  %v1255_v60 = vld [vmem:[#allocation16 + $0xf8] sm:$0xff]  ;;  %v1244_v8 = vld [vmem:[#allocation16 + $0xa0] sm:$0xff] }
 0x82b   :  { %v2365_v12 = vsub.f32 %v1099_v62, %v1107_v10  ;;  %v1253_v62 = vld [vmem:[#allocation16 + $0xe8] sm:$0xff]  ;;  %v1242_v10 = vld [vmem:[#allocation16 + $0x90] sm:$0xff] }
 0x82c   :  { %v1112_v13 = vmul.f32 %v2363_v11, %v2363_v11 }
 0x82d   :  { %v1111_v14 = vmul.f32 %v2365_v12, %v2365_v12 }
 0x82e   :  { %v1115_v15 = vsel %vm222_vm0, %v1112_v13, 0.0  ;;  %v1239_v13 = vld [vmem:[#allocation16 + $0x78] sm:$0xff] }
 0x82f   :  { %1116 = vadd.xlane.f32.xlu0 %v1115_v15  ;;  %1113 = vadd.xlane.f32.xlu1 %v1111_v14  ;;  %v1238_v14 = vld [vmem:[#allocation16 + $0x70] sm:$0xff]  ;;  %v1237_v15 = vld [vmem:[#allocation16 + $0x68] sm:$0xff] }
 0x8b8   :  { %v1117_v43 = vpop.xlane.xlu0 %1116  ;;  %v1114_v44 = vpop.xlane.xlu1 %1113 }
 0x8b9   :  { %v1119_v45 = vmul.f32 0.0078125, %v1117_v43  ;;  %v1118_v46 = vmul.f32 0.0078125, %v1114_v44 }
 0x8bb   :  { %v1121_v47 = vadd.f32 1e-05, %v1119_v45  ;;  %v1120_v48 = vadd.f32 1e-05, %v1118_v46 }
 0x8bd   :  { %1865 = vrsqrt.f32 %v1121_v47 }
 0x8be   :  { %1867 = vrsqrt.f32 %v1120_v48 }
 0x8ca   :  { %v1866_v49 = vpop.eup %1865 }
 0x8cb   :  { %v1868_v51 = vpop.eup %1867  ;;  %v1125_v2 = vmul.f32 %v1866_v49, %v2363_v11  ;;  %v1241_v11 = vld [vmem:[#allocation16 + $0x88] sm:$0xff] }
 0x8cc   :  { %v1124_v53 = vmul.f32 %v1868_v51, %v2365_v12  ;;  %v1240_v12 = vld [vmem:[#allocation16 + $0x80] sm:$0xff] }
 0x8cd   :  { %v1134_v54 = vmul.f32 %v1674_v50, %v1125_v2 }
 0x8ce   :  { %v1133_v55 = vmul.f32 %v1674_v50, %v1124_v53 }
 0x8cf   :  { %v1143_v56 = vadd.f32 %v1675_v52, %v1134_v54 }
 0x8d0   :  { %v1142_v57 = vadd.f32 %v1675_v52, %v1133_v55 }
 0x8d1   :  { %v1145_v58 = vmax.f32 %v1143_v56, 0.0 }
 0x8d2   :  { %v1144_v59 = vmax.f32 %v1142_v57, 0.0 }
 0x8d3   :  { %1834 = vmatprep.subr.msk.mxu1 %vm222_vm0, %v1145_v58 }
 0x8d4   :  { %1353 = vmatmul.mubr.f32.vlgmr.msra.gmra.mxu0 %v1144_v59  ;;  %1835 = vmatpush3.msk.msra.mxu1 %vm222_vm0, %v1145_v58 }
 0x8d5   :  { %1836 = vmatprep.subr.mxu1 %v1144_v59  ;;  %1358 = vmatprep.mubr.f32.mxu0 %v2121_v25 }
 0x8d6   :  { %1837 = vmatpush3.msra.mxu1 %v1144_v59 }
 0x8d7   :  { %1839 = vmatmul.mubr.msk.f32.vlgmr.msra.gmra.mxu1 %vm215_vm1, %v2303_v4  ;;  %1365 = vmatprep.subr.mxu1 %v1255_v60  ;;  %v1245_v4 = vld [vmem:[#allocation16 + $0xa8] sm:$0xff] }
 0x8d8   :  { %1359 = vmatmul.mubr.f32.gmra.mxu0 %v1145_v58  ;;  %1366 = vmatpush1.msra.mxu1 %v1254_v61 }
 0x8d9   :  { %1367 = vmatprep.subr.mxu1 %v1253_v62  ;;  %1429 = vmatprep.mubr.f32.mxu1 %v2121_v25 }
 0x8da   :  { %1368 = vmatpush1.msra.mxu1 %v1252_v63  ;;  %1605 = vmatprep.mubr.f32.mxu0 %v2121_v25 }
 0x8db   :  { %1369 = vmatprep.subr.mxu1 %v1251_v0 }
 0x8dc   :  { %1370 = vmatpush1.msra.mxu1 %v1250_v1 }
 0x8dd   :  { %1371 = vmatprep.subr.mxu1 %v1249_v3 }
 0x8de   :  { %1372 = vmatpush1.msra.mxu1 %v1248_v5 }
 0x8df   :  { %1373 = vmatprep.subr.mxu1 %v1247_v6 }
 0x8e0   :  { %1374 = vmatpush1.msra.mxu1 %v1246_v7 }
 0x8e1   :  { %1375 = vmatprep.subr.mxu1 %v1245_v4 }
 0x8e2   :  { %1376 = vmatpush1.msra.mxu1 %v1244_v8 }
 0x8e3   :  { %1377 = vmatprep.subr.mxu1 %v1243_v9 }
 0x8e4   :  { %1378 = vmatpush1.msra.mxu1 %v1242_v10 }
 0x8e5   :  { %1379 = vmatprep.subr.mxu1 %v1241_v11 }
 0x8e6   :  { %1380 = vmatpush1.msra.mxu1 %v1240_v12 }
 0x8e7   :  { %1381 = vmatprep.subr.mxu1 %v1239_v13 }
 0x8e8   :  { %1382 = vmatpush1.msra.mxu1 %v1238_v14 }
 0x8e9   :  { %1383 = vmatprep.subr.mxu1 %v1237_v15 }
 0x8ea   :  { %1384 = vmatpush1.msra.mxu1 %v1236_v16 }
 0x8eb   :  { %1385 = vmatprep.subr.mxu1 %v1235_v17  ;;  %v1495_v17 = vld [vmem:[%s2437_s21] sm:$0x3] }
 0x8ec   :  { %1386 = vmatpush1.msra.mxu1 %v1234_v18  ;;  %v1504_v18 = vrot.slane %v1495_v17, %v1450_v36 }
 0x8ed   :  { %1387 = vmatprep.subr.mxu1 %v1233_v19 }
 0x8ee   :  { %1388 = vmatpush1.msra.mxu1 %v1232_v20  ;;  %v1500_v20 = vrot.slane %v1495_v17, %v2389_v35 }
 0x8ef   :  { %1389 = vmatprep.subr.mxu1 %v1231_v21  ;;  %v1511_v21 = vld [vmem:[%s2438_s22] sm:$0x3] }
 0x8f0   :  { %1390 = vmatpush1.msra.mxu1 %v1230_v22 }
 0x8f1   :  { %1391 = vmatprep.subr.mxu1 %v1229_v23 }
 0x8f2   :  { %1392 = vmatpush1.msra.mxu1 %v1228_v24 }
 0x8f3   :  { %1393 = vmatprep.subr.mxu1 %v1227_v26 }
 0x8f4   :  { %1394 = vmatpush1.msra.mxu1 %v1226_v27  ;;  %v1520_v27 = vrot.slane %v1511_v21, %v1450_v36  ;;  %v1531_v36 = vld [vmem:[%s2455_s26] sm:$0x3] }
 0x8f5   :  { %1395 = vmatprep.subr.mxu1 %v1225_v28 }
 0x8f6   :  { %1396 = vmatpush1.msra.mxu1 %v1224_v29  ;;  %v1516_v29 = vrot.slane %v1511_v21, %v2389_v35 }
 0x994   :  { %v1354_v34 = vpop.f32.mrf.mxu0 }
 0x996   :  { %v1356_v37 = vpop.f32.mrf.mxu0 }
 0x997   :  { %v1840_v30 = vpop.f32.mrf.mxu1 }
 0x998   :  { %v1360_v43 = vpop.f32.mrf.mxu0 }
 0x999   :  { %v1215_v31 = vpop.f32.mrf.mxu1 }
 0x99a   :  { %1430 = vmatmul.mubr.f32.vlgmr.msra.gmra.mxu1 %v1215_v31  ;;  %v1362_v49 = vpop.f32.mrf.mxu0 }
 0x99b   :  { %1435 = vmatprep.mubr.f32.mxu1 %v2121_v25 }
 0x99e   :  { %1436 = vmatmul.mubr.f32.gmra.mxu1 %v1840_v30 }
 0xa5a   :  { %v1431_v39 = vpop.f32.mrf.mxu1 }
 0xa5b   :  { %v1432_v40 = vadd.f32 %v1431_v39, %v1354_v34 }
 0xa5c   :  { %v1433_v44 = vpop.f32.mrf.mxu1 }
 0xa5d   :  { %v1434_v25 = vadd.f32 %v1433_v44, %v1356_v37  ;;  %v1454_v46 = vadd.f32 %v1447_v41, %v1432_v40 }
 0xa5e   :  { %v1437_v45 = vpop.f32.mrf.mxu1 }
 0xa5f   :  { %v1455_v47 = vadd.f32 %v1451_v42, %v1434_v25  ;;  %v1438_v48 = vadd.f32 %v1437_v45, %v1360_v43 }
 0xa60   :  { %v1439_v50 = vpop.f32.mrf.mxu1 }
 0xa61   :  { %v1456_v51 = vadd.f32 %v1447_v41, %v1438_v48  ;;  %v1440_v2 = vadd.f32 %v1439_v50, %v1362_v49  ;;  %v1458_v52 = vadd.f32 %v1455_v47, %v1454_v46 }
 0xa63   :  { %v1457_v53 = vadd.f32 %v1451_v42, %v1440_v2  ;;  %1459 = vadd.xlane.f32.xlu1 %v1458_v52  ;;  %v1461_v54 = vsel %vm222_vm0, %v1456_v51, 0.0 }
 0xa65   :  { %v1462_v55 = vsel %vm222_vm0, %v1457_v53, 0.0 }
 0xa66   :  { %v1463_v56 = vadd.f32 %v1462_v55, %v1461_v54 }
 0xa68   :  { %1464 = vadd.xlane.f32.xlu0 %v1463_v56 }
 0xaec   :  { %v1460_v57 = vpop.xlane.xlu1 %1459 }
 0xaed   :  { %v1467_v58 = vmul.f32 0.00390625, %v1460_v57 }
 0xaef   :  { %v1469_v59 = vsub.f32 %v1454_v46, %v1467_v58  ;;  %v1470_v60 = vsub.f32 %v1455_v47, %v1467_v58 }
 0xaf1   :  { %v1465_v61 = vpop.xlane.xlu0 %1464  ;;  %v1473_v62 = vmul.f32 %v1469_v59, %v1469_v59  ;;  %v1474_v63 = vmul.f32 %v1470_v60, %v1470_v60 }
 0xaf2   :  { %v1468_v0 = vmul.f32 0.00390625, %v1465_v61 }
 0xaf3   :  { %v1477_v1 = vadd.f32 %v1474_v63, %v1473_v62 }
 0xaf4   :  { %v1471_v3 = vsub.f32 %v1456_v51, %v1468_v0  ;;  %v1472_v5 = vsub.f32 %v1457_v53, %v1468_v0 }
 0xaf5   :  { %1478 = vadd.xlane.f32.xlu1 %v1477_v1 }
 0xaf6   :  { %v1475_v6 = vmul.f32 %v1471_v3, %v1471_v3  ;;  %v1476_v7 = vmul.f32 %v1472_v5, %v1472_v5 }
 0xaf8   :  { %v1480_v4 = vsel %vm222_vm0, %v1475_v6, 0.0  ;;  %v1481_v8 = vsel %vm222_vm0, %v1476_v7, 0.0 }
 0xaf9   :  { %v1482_v9 = vadd.f32 %v1481_v8, %v1480_v4 }
 0xafb   :  { %1483 = vadd.xlane.f32.xlu0 %v1482_v9 }
 0xb7e   :  { %v1479_v10 = vpop.xlane.xlu1 %1478 }
 0xb7f   :  { %v1485_v11 = vmul.f32 0.00390625, %v1479_v10 }
 0xb81   :  { %v1487_v12 = vadd.f32 1e-05, %v1485_v11 }
 0xb83   :  { %1869 = vrsqrt.f32 %v1487_v12 }
 0xb84   :  { %v1484_v13 = vpop.xlane.xlu0 %1483 }
 0xb85   :  { %v1486_v14 = vmul.f32 0.00390625, %v1484_v13 }
 0xb87   :  { %v1488_v15 = vadd.f32 1e-05, %v1486_v14 }
 0xb89   :  { %1871 = vrsqrt.f32 %v1488_v15 }
 0xb90   :  { %v1870_v16 = vpop.eup %1869 }
 0xb91   :  { %v1492_v19 = vmul.f32 %v1870_v16, %v1470_v60  ;;  %v1491_v22 = vmul.f32 %v1870_v16, %v1469_v59 }
 0xb93   :  { %v1508_v28 = vmul.f32 %v1504_v18, %v1492_v19  ;;  %v1507_v30 = vmul.f32 %v1500_v20, %v1491_v22 }
 0xb95   :  { %v1524_v37 = vadd.f32 %v1520_v27, %v1508_v28  ;;  %v1523_v38 = vadd.f32 %v1516_v29, %v1507_v30 }
 0xb96   :  { %v1872_v23 = vpop.eup %1871 }
 0xb97   :  { %v1493_v24 = vmul.f32 %v1872_v23, %v1471_v3  ;;  %v1494_v26 = vmul.f32 %v1872_v23, %v1472_v5  ;;  %v1528_v41 = vmax.f32 %v1524_v37, 0.0  ;;  %v1527_v42 = vmax.f32 %v1523_v38, 0.0 }
 0xb99   :  { %v1510_v31 = vmul.f32 %v1504_v18, %v1494_v26  ;;  %v1509_v32 = vmul.f32 %v1500_v20, %v1493_v24 }
 0xb9b   :  { %v1526_v33 = vadd.f32 %v1520_v27, %v1510_v31  ;;  %v1525_v34 = vadd.f32 %v1516_v29, %v1509_v32 }
 0xb9d   :  { %v1530_v39 = vmax.f32 %v1526_v33, 0.0  ;;  %v1529_v40 = vmax.f32 %v1525_v34, 0.0 }
 0xb9f   :  { %1679 = vmatprep.subr.msk.mxu0 %vm222_vm0, %v1530_v39 }
 0xba0   :  { %1680 = vmatpush1.msk.msra.mxu0 %vm222_vm0, %v1529_v40 }
 0xba1   :  { %1571 = vmatprep.subr.mxu0 %v1528_v41 }
 0xba2   :  { %1572 = vmatpush1.msra.mxu0 %v1527_v42 }
 0xba3   :  { %1681 = vmatmul.mubr.msk.f32.vlgmr.msra.gmra.mxu0 %vm215_vm1, %v1531_v36 }
 0xc63   :  { %v1607_v35 = vpop.f32.mrf.mxu0 }
 0xc65   :  { %v1609_v43 = vpop.f32.mrf.mxu0 }
 0xc66   :  { %v1614_v44 = vcombine.low %v1607_v35, %v1609_v43 }
 0xc68   :  { %1682 = vst.sshfl [vmem:[#allocation19] sm:$0x33 pattern:$0x76325410] %v1614_v44 }
 0xc69   :  { %2084 = shalt.err (!%p2081_p12)
}
 0xc6a   :  { %1633 = dma.vmem_to_hbm [thread:$0]  %s1631_s19, 64, %s2439_s23, [#allocation4]  }
 0xc6b   :  { %2105 = dma.done.wait [#allocation4], 64  }
 0xc6c   :  { %2106 = vsyncadd [#allocation4], 4294967232 }
 0xc6d   :  { %1637 = vsyncpa [#allocation3], 1 }
 0xc6e   :  { %1638 = vsyncpa [#allocation6], 1 }
 0xc6f   :  { %1639 = vsyncpa [#allocation9], 1 }
 0xc70   :  { %1640 = vsyncpa [#allocation12], 1 }
 0xc71   :  { %1641 = vsyncpa [#allocation15], 1 }
 0xc72   :  { %1642 = vsyncpa [#allocation18], 1 }
 0xc73   :  { %1643 = vsyncpa [#allocation4], 1 }

</bundles_post_ra>
